<compile_context>
chip_gen: v5e
topology: v5e:2x2
jax: 0.10.0
libtpu: 0.0.40
codegen_flags: <defaults>
</compile_context>

<pallas_src>
import functools

import jax
import jax.numpy as jnp
from jax.experimental import pallas as pl
from jax.experimental.pallas import tpu as pltpu


def _text_features_kernel(hid_ref, bbox_ref, hw_ref, w1_ref, b1_ref, w2_ref,
                          b2_ref, o_ref, *, gb, L, C):
    # ---- text-encoder fc head over the whole doc block (M = gb*L rows) -----
    # Linear -> ReLU -> (Dropout p=0 == identity) -> Linear, bf16 in / f32 acc.
    h1 = jnp.dot(hid_ref[...], w1_ref[...],
                 preferred_element_type=jnp.float32)                # (gb*L, 512)
    h1 = jnp.maximum(h1 + b1_ref[...], 0.0)
    enc = jnp.dot(h1.astype(jnp.bfloat16), w2_ref[...],
                  preferred_element_type=jnp.float32) + b2_ref[...]  # (gb*L, C)
    enc3 = enc.reshape(gb, L, C)          # L % 8 == 0 -> layout-preserving split

    # ---- bbox-mode mask rasterization; no int div/mod -----------------------
    h_idx = hw_ref[0:1]                                             # (1, 1, P)
    w_idx = hw_ref[1:2]                                             # (1, 1, P)
    x0 = bbox_ref[:, :, 0:1]
    y0 = bbox_ref[:, :, 1:2]
    x1 = bbox_ref[:, :, 2:3]
    y1 = bbox_ref[:, :, 3:4]                                        # (gb, L, 1)
    mask = ((h_idx >= y0) & (h_idx < y1) &
            (w_idx >= x0) & (w_idx < x1)).astype(jnp.float32)       # (gb, L, P)

    # ---- masked scatter-add over text lines + average -----------------------
    sum_mask = jnp.sum(mask, axis=1, keepdims=True)                 # (gb, 1, P)
    inv = pl.reciprocal(jnp.maximum(sum_mask, 1.0), approx=True)    # EUP recip
    for c in range(C):   # K = L contraction on the VPU; MXU stays on the FC
        s = jnp.sum(enc3[:, :, c:c + 1] * mask, axis=1, keepdims=True)
        o_ref[:, c:c + 1, :] = s * inv


def _pick_gb(G, L, C, P, hidden, mid, vmem_budget=24 * 1024 * 1024):
    """Documents per grid step.

    Targets gb*L ~= 256 MXU rows, prefers >= 2 grid steps (v7x has two
    TensorCores sharded via dimension_semantics='parallel'), and keeps the
    per-step VMEM footprint well under the default scoped limit so the same
    choice is safe on v7x (64 MiB physical VMEM) as well as v5e/v6e (128 MiB).
    """
    def fits(gb):
        rows = gb * L
        bytes_ = 2 * (rows * hidden * 2 + gb * L * 4 * 4)     # dbl-buffered inputs
        bytes_ += 2 * (gb * C * P * 4)                        # dbl-buffered output
        bytes_ += rows * mid * 4 + rows * C * 4 + gb * L * P * 4   # h1, enc, mask
        bytes_ += hidden * mid * 2 + mid * C * 2 + (mid + C) * 4   # weights/biases
        return bytes_ <= vmem_budget

    target = max(1, 256 // max(L, 1))
    divisors = [d for d in range(1, G + 1) if G % d == 0 and fits(d)]
    if not divisors:
        return 1
    multi_step = [d for d in divisors if G // d >= 2]
    pool = multi_step if multi_step else divisors
    return min(pool, key=lambda d: (abs(d - target), -d))


def text_features_array(hid, bbox, w1, b1, w2, b2, *, B, N, C, H, W, gb=None):
    """hid: [B, N, L, hidden] f32, bbox: [B, N, L, 4] i32 (already scaled)."""
    G = B * N
    L = hid.shape[2]
    hidden = hid.shape[3]
    mid = w1.shape[1]
    P = H * W
    assert L % 8 == 0, "L (text lines per doc) must be a multiple of 8"

    if gb is None:
        gb = _pick_gb(G, L, C, P, hidden, mid)
    assert G % gb == 0

    # Flatten text lines for the FC head; docs stay grouped (gb docs / step).
    hid_flat = hid.reshape(G * L, hidden).astype(jnp.bfloat16)
    bbox3 = bbox.reshape(G, L, 4).astype(jnp.int32)
    w1_bf = w1.astype(jnp.bfloat16)
    w2_bf = w2.astype(jnp.bfloat16)

    # Grid-invariant plane indices (h = p // W, w = p % W) precomputed once.
    h_plane = jnp.repeat(jnp.arange(H, dtype=jnp.int32), W)
    w_plane = jnp.tile(jnp.arange(W, dtype=jnp.int32), H)
    hw = jnp.stack([h_plane, w_plane], axis=0).reshape(2, 1, P)

    kernel = functools.partial(_text_features_kernel, gb=gb, L=L, C=C)
    out = pl.pallas_call(
        kernel,
        out_shape=jax.ShapeDtypeStruct((G, C, P), jnp.float32),
        grid_spec=pltpu.PrefetchScalarGridSpec(
            num_scalar_prefetch=0,
            grid=(G // gb,),
            in_specs=[
                pl.BlockSpec((gb * L, hidden), lambda g: (g, 0)),
                pl.BlockSpec((gb, L, 4), lambda g: (g, 0, 0)),
                pl.BlockSpec((2, 1, P), lambda g: (0, 0, 0)),
                pl.BlockSpec((hidden, mid), lambda g: (0, 0)),
                pl.BlockSpec((1, mid), lambda g: (0, 0)),
                pl.BlockSpec((mid, C), lambda g: (0, 0)),
                pl.BlockSpec((1, C), lambda g: (0, 0)),
            ],
            out_specs=pl.BlockSpec((gb, C, P), lambda g: (g, 0, 0)),
        ),
        compiler_params=pltpu.CompilerParams(
            dimension_semantics=("parallel",)),
    )(hid_flat, bbox3, hw, w1_bf, b1, w2_bf, b2)
    return out.reshape(B, N, C, H, W)


if __name__ == "__main__":
    # Small shapes consistent with the module's forward.
    B, N, L = 2, 4, 8                 # batches, documents per batch, text lines
    C, H, W = 8, 16, 16               # channels, height, width
    old_H, old_W = 64, 64             # original coordinate space
    hidden, mid = 32, 512             # pooled-feature dim, fc hidden (=512)

    key = jax.random.PRNGKey(0)
    k_hid, k_w1, k_b1, k_w2, k_b2, k_box, k_wh, k_valid = jax.random.split(key, 8)

    # Synthetic per-text-line pooled RoBERTa [CLS] features.
    hid = jax.random.normal(k_hid, (B, N, L, hidden), dtype=jnp.float32)

    # Deterministic fc-head parameters: LazyLinear(hidden->512), Linear(512->C).
    w1 = jax.random.normal(k_w1, (hidden, mid), dtype=jnp.float32) / jnp.sqrt(hidden)
    b1 = jax.random.normal(k_b1, (1, mid), dtype=jnp.float32) * 0.01
    w2 = jax.random.normal(k_w2, (mid, C), dtype=jnp.float32) / jnp.sqrt(mid)
    b2 = jax.random.normal(k_b2, (1, C), dtype=jnp.float32) * 0.01

    # Bounding boxes in old coords, scaled exactly like the module:
    # scale = ([W, H] - 1) / ([old_W, old_H] - 1); round to int.
    xy0 = jax.random.uniform(k_box, (B, N, L, 2), minval=0.0, maxval=old_W / 2)
    wh = jax.random.uniform(k_wh, (B, N, L, 2), minval=4.0, maxval=old_W / 2)
    bbox_old = jnp.concatenate([xy0, xy0 + wh], axis=-1)           # x0,y0,x1,y1
    scale = (jnp.array([W, H], jnp.float32) - 1.0) / \
            (jnp.array([old_W, old_H], jnp.float32) - 1.0)
    bbox = jnp.round(bbox_old * jnp.concatenate([scale, scale])).astype(jnp.int32)

    # Lines with empty text / missing bbox are skipped in the module ->
    # represent them with an empty (all-zero) bbox.
    valid = jax.random.bernoulli(k_valid, 0.75, (B, N, L, 1))
    bbox = jnp.where(valid, bbox, 0)

    out = text_features_array(hid, bbox, w1, b1, w2, b2, B=B, N=N, C=C, H=H, W=W)
    out = jax.block_until_ready(out)
    assert out.shape == (B, N, C, H, W) and out.dtype == jnp.float32

    # Pure-JAX reference mirroring the kernel's bf16-operand / f32-accum FC
    # head (loose tol also covers the approx reciprocal and MXU rounding).
    hid_bf = hid.astype(jnp.bfloat16)
    w1_bf = w1.astype(jnp.bfloat16)
    w2_bf = w2.astype(jnp.bfloat16)
    h1 = jnp.maximum(
        jnp.einsum('bnlh,hm->bnlm', hid_bf, w1_bf,
                   preferred_element_type=jnp.float32) + b1[0], 0.0)
    enc = jnp.einsum('bnlm,mc->bnlc', h1.astype(jnp.bfloat16), w2_bf,
                     preferred_element_type=jnp.float32) + b2[0]
    hh = jnp.arange(H).reshape(1, 1, 1, H, 1)
    ww = jnp.arange(W).reshape(1, 1, 1, 1, W)
    m = ((hh >= bbox[..., 1, None, None]) & (hh < bbox[..., 3, None, None]) &
         (ww >= bbox[..., 0, None, None]) & (ww < bbox[..., 2, None, None]))
    m = m.astype(jnp.float32)                                      # (B,N,L,H,W)
    sum_arr = jnp.einsum('bnlc,bnlhw->bnchw', enc, m)
    sum_mask = m.sum(axis=2)[:, :, None]
    ref = sum_arr / jnp.maximum(sum_mask, 1.0)
    err = float(jnp.max(jnp.abs(out - ref)))
    assert jnp.allclose(out, ref, rtol=3e-2, atol=3e-2), err

    print("KERNEL_OK")
</pallas_src>

<mosaic_0001>
module attributes {stable_mosaic.version = 11 : i64} {
  func.func @_text_features_kernel(%arg0: i32, %arg1: memref<32x32xbf16, #tpu.memory_space<vmem>>, %arg2: memref<4x8x4xi32, #tpu.memory_space<vmem>>, %arg3: memref<2x1x256xi32, #tpu.memory_space<vmem>>, %arg4: memref<32x512xbf16, #tpu.memory_space<vmem>>, %arg5: memref<1x512xf32, #tpu.memory_space<vmem>>, %arg6: memref<512x8xbf16, #tpu.memory_space<vmem>>, %arg7: memref<1x8xf32, #tpu.memory_space<vmem>>, %arg8: memref<4x8x256xf32, #tpu.memory_space<vmem>>) attributes {dimension_semantics = [#tpu.dimension_semantics<parallel>], iteration_bounds = array<i64: 2>, scalar_prefetch = 0 : i64, scratch_operands = 0 : i64, tpu.core_type = #tpu.core_type<tc>, window_params = [{transform_indices = @transform_0, window_bounds = array<i64: 32, 32>}, {transform_indices = @transform_1, window_bounds = array<i64: 4, 8, 4>}, {pipeline_mode = #tpu.pipeline_mode<synchronous>, transform_indices = @transform_2, window_bounds = array<i64: 2, 1, 256>}, {pipeline_mode = #tpu.pipeline_mode<synchronous>, transform_indices = @transform_3, window_bounds = array<i64: 32, 512>}, {pipeline_mode = #tpu.pipeline_mode<synchronous>, transform_indices = @transform_4, window_bounds = array<i64: 1, 512>}, {pipeline_mode = #tpu.pipeline_mode<synchronous>, transform_indices = @transform_5, window_bounds = array<i64: 512, 8>}, {pipeline_mode = #tpu.pipeline_mode<synchronous>, transform_indices = @transform_6, window_bounds = array<i64: 1, 8>}, {transform_indices = @transform_7, window_bounds = array<i64: 4, 8, 256>}]} {
    %c0 = arith.constant 0 : index
    %c0_0 = arith.constant 0 : index
    %0 = vector.load %arg1[%c0, %c0_0] : memref<32x32xbf16, #tpu.memory_space<vmem>>, vector<32x32xbf16>
    %c0_1 = arith.constant 0 : index
    %c0_2 = arith.constant 0 : index
    %1 = vector.load %arg4[%c0_1, %c0_2] : memref<32x512xbf16, #tpu.memory_space<vmem>>, vector<32x512xbf16>
    %cst = arith.constant dense<0.000000e+00> : vector<32x512xf32>
    %2 = tpu.matmul %0, %1, %cst {dimension_numbers = #tpu.dot_dimension_numbers<[1], [0], [0], [1], [0, 0, 1, 1], [], []>} : vector<32x32xbf16>, vector<32x512xbf16>, vector<32x512xf32> -> vector<32x512xf32>
    %c0_3 = arith.constant 0 : index
    %c0_4 = arith.constant 0 : index
    %3 = vector.load %arg5[%c0_3, %c0_4] : memref<1x512xf32, #tpu.memory_space<vmem>>, vector<1x512xf32>
    %4 = vector.broadcast %3 : vector<1x512xf32> to vector<32x512xf32>
    %5 = arith.addf %2, %4 : vector<32x512xf32>
    %cst_5 = arith.constant 0.000000e+00 : f32
    %6 = vector.broadcast %cst_5 : f32 to vector<32x512xf32>
    %7 = arith.maximumf %5, %6 : vector<32x512xf32>
    %8 = arith.truncf %7 : vector<32x512xf32> to vector<32x512xbf16>
    %c0_6 = arith.constant 0 : index
    %c0_7 = arith.constant 0 : index
    %9 = vector.load %arg6[%c0_6, %c0_7] : memref<512x8xbf16, #tpu.memory_space<vmem>>, vector<512x8xbf16>
    %cst_8 = arith.constant dense<0.000000e+00> : vector<32x8xf32>
    %10 = tpu.matmul %8, %9, %cst_8 {dimension_numbers = #tpu.dot_dimension_numbers<[1], [0], [0], [1], [0, 0, 1, 1], [], []>} : vector<32x512xbf16>, vector<512x8xbf16>, vector<32x8xf32> -> vector<32x8xf32>
    %c0_9 = arith.constant 0 : index
    %c0_10 = arith.constant 0 : index
    %11 = vector.load %arg7[%c0_9, %c0_10] : memref<1x8xf32, #tpu.memory_space<vmem>>, vector<1x8xf32>
    %12 = vector.broadcast %11 : vector<1x8xf32> to vector<32x8xf32>
    %13 = arith.addf %10, %12 : vector<32x8xf32>
    %14 = vector.shape_cast %13 : vector<32x8xf32> to vector<4x8x8xf32>
    %c0_11 = arith.constant 0 : index
    %c0_12 = arith.constant 0 : index
    %c0_13 = arith.constant 0 : index
    %15 = vector.load %arg3[%c0_11, %c0_12, %c0_13] : memref<2x1x256xi32, #tpu.memory_space<vmem>>, vector<1x1x256xi32>
    %c1 = arith.constant 1 : index
    %c0_14 = arith.constant 0 : index
    %c0_15 = arith.constant 0 : index
    %16 = vector.load %arg3[%c1, %c0_14, %c0_15] : memref<2x1x256xi32, #tpu.memory_space<vmem>>, vector<1x1x256xi32>
    %c0_16 = arith.constant 0 : index
    %c0_17 = arith.constant 0 : index
    %c0_18 = arith.constant 0 : index
    %17 = vector.load %arg2[%c0_16, %c0_17, %c0_18] : memref<4x8x4xi32, #tpu.memory_space<vmem>>, vector<4x8x1xi32>
    %c0_19 = arith.constant 0 : index
    %c0_20 = arith.constant 0 : index
    %c1_21 = arith.constant 1 : index
    %18 = vector.load %arg2[%c0_19, %c0_20, %c1_21] : memref<4x8x4xi32, #tpu.memory_space<vmem>>, vector<4x8x1xi32>
    %c0_22 = arith.constant 0 : index
    %c0_23 = arith.constant 0 : index
    %c2 = arith.constant 2 : index
    %19 = vector.load %arg2[%c0_22, %c0_23, %c2] : memref<4x8x4xi32, #tpu.memory_space<vmem>>, vector<4x8x1xi32>
    %c0_24 = arith.constant 0 : index
    %c0_25 = arith.constant 0 : index
    %c3 = arith.constant 3 : index
    %20 = vector.load %arg2[%c0_24, %c0_25, %c3] : memref<4x8x4xi32, #tpu.memory_space<vmem>>, vector<4x8x1xi32>
    %21 = vector.broadcast %15 : vector<1x1x256xi32> to vector<4x8x256xi32>
    %22 = vector.broadcast %18 : vector<4x8x1xi32> to vector<4x8x256xi32>
    %23 = arith.cmpi sge, %21, %22 : vector<4x8x256xi32>
    %24 = vector.broadcast %15 : vector<1x1x256xi32> to vector<4x8x256xi32>
    %25 = vector.broadcast %20 : vector<4x8x1xi32> to vector<4x8x256xi32>
    %26 = arith.cmpi slt, %24, %25 : vector<4x8x256xi32>
    %27 = arith.andi %23, %26 : vector<4x8x256xi1>
    %28 = vector.broadcast %16 : vector<1x1x256xi32> to vector<4x8x256xi32>
    %29 = vector.broadcast %17 : vector<4x8x1xi32> to vector<4x8x256xi32>
    %30 = arith.cmpi sge, %28, %29 : vector<4x8x256xi32>
    %31 = arith.andi %27, %30 : vector<4x8x256xi1>
    %32 = vector.broadcast %16 : vector<1x1x256xi32> to vector<4x8x256xi32>
    %33 = vector.broadcast %19 : vector<4x8x1xi32> to vector<4x8x256xi32>
    %34 = arith.cmpi slt, %32, %33 : vector<4x8x256xi32>
    %35 = arith.andi %31, %34 : vector<4x8x256xi1>
    %36 = arith.extui %35 : vector<4x8x256xi1> to vector<4x8x256xi32>
    %37 = arith.sitofp %36 : vector<4x8x256xi32> to vector<4x8x256xf32>
    %cst_26 = arith.constant dense<0.000000e+00> : vector<4x256xf32>
    %38 = vector.multi_reduction <add>, %37, %cst_26 [1] : vector<4x8x256xf32> to vector<4x256xf32>
    %39 = vector.shape_cast %38 : vector<4x256xf32> to vector<4x1x256xf32>
    %cst_27 = arith.constant 1.000000e+00 : f32
    %40 = vector.broadcast %cst_27 : f32 to vector<4x1x256xf32>
    %41 = arith.maximumf %39, %40 : vector<4x1x256xf32>
    %42 = tpu.reciprocal %41 {approx = true} : vector<4x1x256xf32> -> vector<4x1x256xf32>
    %43 = vector.extract_strided_slice %14 {offsets = [0, 0, 0], sizes = [4, 8, 1], strides = [1, 1, 1]} : vector<4x8x8xf32> to vector<4x8x1xf32>
    %44 = vector.broadcast %43 : vector<4x8x1xf32> to vector<4x8x256xf32>
    %45 = arith.mulf %44, %37 : vector<4x8x256xf32>
    %cst_28 = arith.constant dense<0.000000e+00> : vector<4x256xf32>
    %46 = vector.multi_reduction <add>, %45, %cst_28 [1] : vector<4x8x256xf32> to vector<4x256xf32>
    %47 = vector.shape_cast %46 : vector<4x256xf32> to vector<4x1x256xf32>
    %48 = arith.mulf %47, %42 : vector<4x1x256xf32>
    %c0_29 = arith.constant 0 : index
    %c0_30 = arith.constant 0 : index
    %c0_31 = arith.constant 0 : index
    %49 = vector.load %arg8[%c0_29, %c0_30, %c0_31] : memref<4x8x256xf32, #tpu.memory_space<vmem>>, vector<4x1x256xf32>
    tpu.vector_store %arg8[%c0_29, %c0_30, %c0_31], %48 {strides = array<i32>} : memref<4x8x256xf32, #tpu.memory_space<vmem>>, vector<4x1x256xf32>,
    %50 = vector.extract_strided_slice %14 {offsets = [0, 0, 1], sizes = [4, 8, 1], strides = [1, 1, 1]} : vector<4x8x8xf32> to vector<4x8x1xf32>
    %51 = vector.broadcast %50 : vector<4x8x1xf32> to vector<4x8x256xf32>
    %52 = arith.mulf %51, %37 : vector<4x8x256xf32>
    %cst_32 = arith.constant dense<0.000000e+00> : vector<4x256xf32>
    %53 = vector.multi_reduction <add>, %52, %cst_32 [1] : vector<4x8x256xf32> to vector<4x256xf32>
    %54 = vector.shape_cast %53 : vector<4x256xf32> to vector<4x1x256xf32>
    %55 = arith.mulf %54, %42 : vector<4x1x256xf32>
    %c0_33 = arith.constant 0 : index
    %c1_34 = arith.constant 1 : index
    %c0_35 = arith.constant 0 : index
    %56 = vector.load %arg8[%c0_33, %c1_34, %c0_35] : memref<4x8x256xf32, #tpu.memory_space<vmem>>, vector<4x1x256xf32>
    tpu.vector_store %arg8[%c0_33, %c1_34, %c0_35], %55 {strides = array<i32>} : memref<4x8x256xf32, #tpu.memory_space<vmem>>, vector<4x1x256xf32>,
    %57 = vector.extract_strided_slice %14 {offsets = [0, 0, 2], sizes = [4, 8, 1], strides = [1, 1, 1]} : vector<4x8x8xf32> to vector<4x8x1xf32>
    %58 = vector.broadcast %57 : vector<4x8x1xf32> to vector<4x8x256xf32>
    %59 = arith.mulf %58, %37 : vector<4x8x256xf32>
    %cst_36 = arith.constant dense<0.000000e+00> : vector<4x256xf32>
    %60 = vector.multi_reduction <add>, %59, %cst_36 [1] : vector<4x8x256xf32> to vector<4x256xf32>
    %61 = vector.shape_cast %60 : vector<4x256xf32> to vector<4x1x256xf32>
    %62 = arith.mulf %61, %42 : vector<4x1x256xf32>
    %c0_37 = arith.constant 0 : index
    %c2_38 = arith.constant 2 : index
    %c0_39 = arith.constant 0 : index
    %63 = vector.load %arg8[%c0_37, %c2_38, %c0_39] : memref<4x8x256xf32, #tpu.memory_space<vmem>>, vector<4x1x256xf32>
    tpu.vector_store %arg8[%c0_37, %c2_38, %c0_39], %62 {strides = array<i32>} : memref<4x8x256xf32, #tpu.memory_space<vmem>>, vector<4x1x256xf32>,
    %64 = vector.extract_strided_slice %14 {offsets = [0, 0, 3], sizes = [4, 8, 1], strides = [1, 1, 1]} : vector<4x8x8xf32> to vector<4x8x1xf32>
    %65 = vector.broadcast %64 : vector<4x8x1xf32> to vector<4x8x256xf32>
    %66 = arith.mulf %65, %37 : vector<4x8x256xf32>
    %cst_40 = arith.constant dense<0.000000e+00> : vector<4x256xf32>
    %67 = vector.multi_reduction <add>, %66, %cst_40 [1] : vector<4x8x256xf32> to vector<4x256xf32>
    %68 = vector.shape_cast %67 : vector<4x256xf32> to vector<4x1x256xf32>
    %69 = arith.mulf %68, %42 : vector<4x1x256xf32>
    %c0_41 = arith.constant 0 : index
    %c3_42 = arith.constant 3 : index
    %c0_43 = arith.constant 0 : index
    %70 = vector.load %arg8[%c0_41, %c3_42, %c0_43] : memref<4x8x256xf32, #tpu.memory_space<vmem>>, vector<4x1x256xf32>
    tpu.vector_store %arg8[%c0_41, %c3_42, %c0_43], %69 {strides = array<i32>} : memref<4x8x256xf32, #tpu.memory_space<vmem>>, vector<4x1x256xf32>,
    %71 = vector.extract_strided_slice %14 {offsets = [0, 0, 4], sizes = [4, 8, 1], strides = [1, 1, 1]} : vector<4x8x8xf32> to vector<4x8x1xf32>
    %72 = vector.broadcast %71 : vector<4x8x1xf32> to vector<4x8x256xf32>
    %73 = arith.mulf %72, %37 : vector<4x8x256xf32>
    %cst_44 = arith.constant dense<0.000000e+00> : vector<4x256xf32>
    %74 = vector.multi_reduction <add>, %73, %cst_44 [1] : vector<4x8x256xf32> to vector<4x256xf32>
    %75 = vector.shape_cast %74 : vector<4x256xf32> to vector<4x1x256xf32>
    %76 = arith.mulf %75, %42 : vector<4x1x256xf32>
    %c0_45 = arith.constant 0 : index
    %c4 = arith.constant 4 : index
    %c0_46 = arith.constant 0 : index
    %77 = vector.load %arg8[%c0_45, %c4, %c0_46] : memref<4x8x256xf32, #tpu.memory_space<vmem>>, vector<4x1x256xf32>
    tpu.vector_store %arg8[%c0_45, %c4, %c0_46], %76 {strides = array<i32>} : memref<4x8x256xf32, #tpu.memory_space<vmem>>, vector<4x1x256xf32>,
    %78 = vector.extract_strided_slice %14 {offsets = [0, 0, 5], sizes = [4, 8, 1], strides = [1, 1, 1]} : vector<4x8x8xf32> to vector<4x8x1xf32>
    %79 = vector.broadcast %78 : vector<4x8x1xf32> to vector<4x8x256xf32>
    %80 = arith.mulf %79, %37 : vector<4x8x256xf32>
    %cst_47 = arith.constant dense<0.000000e+00> : vector<4x256xf32>
    %81 = vector.multi_reduction <add>, %80, %cst_47 [1] : vector<4x8x256xf32> to vector<4x256xf32>
    %82 = vector.shape_cast %81 : vector<4x256xf32> to vector<4x1x256xf32>
    %83 = arith.mulf %82, %42 : vector<4x1x256xf32>
    %c0_48 = arith.constant 0 : index
    %c5 = arith.constant 5 : index
    %c0_49 = arith.constant 0 : index
    %84 = vector.load %arg8[%c0_48, %c5, %c0_49] : memref<4x8x256xf32, #tpu.memory_space<vmem>>, vector<4x1x256xf32>
    tpu.vector_store %arg8[%c0_48, %c5, %c0_49], %83 {strides = array<i32>} : memref<4x8x256xf32, #tpu.memory_space<vmem>>, vector<4x1x256xf32>,
    %85 = vector.extract_strided_slice %14 {offsets = [0, 0, 6], sizes = [4, 8, 1], strides = [1, 1, 1]} : vector<4x8x8xf32> to vector<4x8x1xf32>
    %86 = vector.broadcast %85 : vector<4x8x1xf32> to vector<4x8x256xf32>
    %87 = arith.mulf %86, %37 : vector<4x8x256xf32>
    %cst_50 = arith.constant dense<0.000000e+00> : vector<4x256xf32>
    %88 = vector.multi_reduction <add>, %87, %cst_50 [1] : vector<4x8x256xf32> to vector<4x256xf32>
    %89 = vector.shape_cast %88 : vector<4x256xf32> to vector<4x1x256xf32>
    %90 = arith.mulf %89, %42 : vector<4x1x256xf32>
    %c0_51 = arith.constant 0 : index
    %c6 = arith.constant 6 : index
    %c0_52 = arith.constant 0 : index
    %91 = vector.load %arg8[%c0_51, %c6, %c0_52] : memref<4x8x256xf32, #tpu.memory_space<vmem>>, vector<4x1x256xf32>
    tpu.vector_store %arg8[%c0_51, %c6, %c0_52], %90 {strides = array<i32>} : memref<4x8x256xf32, #tpu.memory_space<vmem>>, vector<4x1x256xf32>,
    %92 = vector.extract_strided_slice %14 {offsets = [0, 0, 7], sizes = [4, 8, 1], strides = [1, 1, 1]} : vector<4x8x8xf32> to vector<4x8x1xf32>
    %93 = vector.broadcast %92 : vector<4x8x1xf32> to vector<4x8x256xf32>
    %94 = arith.mulf %93, %37 : vector<4x8x256xf32>
    %cst_53 = arith.constant dense<0.000000e+00> : vector<4x256xf32>
    %95 = vector.multi_reduction <add>, %94, %cst_53 [1] : vector<4x8x256xf32> to vector<4x256xf32>
    %96 = vector.shape_cast %95 : vector<4x256xf32> to vector<4x1x256xf32>
    %97 = arith.mulf %96, %42 : vector<4x1x256xf32>
    %c0_54 = arith.constant 0 : index
    %c7 = arith.constant 7 : index
    %c0_55 = arith.constant 0 : index
    %98 = vector.load %arg8[%c0_54, %c7, %c0_55] : memref<4x8x256xf32, #tpu.memory_space<vmem>>, vector<4x1x256xf32>
    tpu.vector_store %arg8[%c0_54, %c7, %c0_55], %97 {strides = array<i32>} : memref<4x8x256xf32, #tpu.memory_space<vmem>>, vector<4x1x256xf32>,
    return
  }
  func.func @transform_0(%arg0: i32) -> (i32, i32) {
    %c0_i32 = arith.constant 0 : i32
    %c0_i32_0 = arith.constant 0 : i32
    return %arg0, %c0_i32 : i32, i32
  }
  func.func @transform_1(%arg0: i32) -> (i32, i32, i32) {
    %c0_i32 = arith.constant 0 : i32
    %c0_i32_0 = arith.constant 0 : i32
    %c0_i32_1 = arith.constant 0 : i32
    return %arg0, %c0_i32, %c0_i32_0 : i32, i32, i32
  }
  func.func @transform_2(%arg0: i32) -> (i32, i32, i32) {
    %c0_i32 = arith.constant 0 : i32
    %c0_i32_0 = arith.constant 0 : i32
    %c0_i32_1 = arith.constant 0 : i32
    %c0_i32_2 = arith.constant 0 : i32
    return %c0_i32, %c0_i32_0, %c0_i32_1 : i32, i32, i32
  }
  func.func @transform_3(%arg0: i32) -> (i32, i32) {
    %c0_i32 = arith.constant 0 : i32
    %c0_i32_0 = arith.constant 0 : i32
    %c0_i32_1 = arith.constant 0 : i32
    return %c0_i32, %c0_i32_0 : i32, i32
  }
  func.func @transform_4(%arg0: i32) -> (i32, i32) {
    %c0_i32 = arith.constant 0 : i32
    %c0_i32_0 = arith.constant 0 : i32
    %c0_i32_1 = arith.constant 0 : i32
    return %c0_i32, %c0_i32_0 : i32, i32
  }
  func.func @transform_5(%arg0: i32) -> (i32, i32) {
    %c0_i32 = arith.constant 0 : i32
    %c0_i32_0 = arith.constant 0 : i32
    %c0_i32_1 = arith.constant 0 : i32
    return %c0_i32, %c0_i32_0 : i32, i32
  }
  func.func @transform_6(%arg0: i32) -> (i32, i32) {
    %c0_i32 = arith.constant 0 : i32
    %c0_i32_0 = arith.constant 0 : i32
    %c0_i32_1 = arith.constant 0 : i32
    return %c0_i32, %c0_i32_0 : i32, i32
  }
  func.func @transform_7(%arg0: i32) -> (i32, i32, i32) {
    %c0_i32 = arith.constant 0 : i32
    %c0_i32_0 = arith.constant 0 : i32
    %c0_i32_1 = arith.constant 0 : i32
    return %arg0, %c0_i32, %c0_i32_0 : i32, i32, i32
  }
}

</mosaic_0001>

<bundles_post_ra>
// kernel: tpu_custom_call.1
= control target key start
LH: loop header
LB: loop body
LE: loop exit
PB: predicated region body
PF: predicated region fallthrough
CT: control target
= control target key end

     0   :  { %12 = vsyncpa [#allocation3], 0  ;;  %s3303_s0 = inlined_call_operand.vmem [shape: bf16[64,32], index: 0, kind: input, shape index: {}]   ;;  %s3304_s1 = inlined_call_operand.vmem [shape: s32[8,8,4], index: 1, kind: input, shape index: {}]   ;;  %s3305_s2 = inlined_call_operand.vmem [shape: s32[2,1,256], index: 2, kind: input, shape index: {}]   ;;  %s3306_s3 = inlined_call_operand.vmem [shape: bf16[32,512], index: 3, kind: input, shape index: {}]   ;;  %s3307_s4 = inlined_call_operand.vmem [shape: f32[1,512], index: 4, kind: input, shape index: {}]   ;;  %s3308_s5 = inlined_call_operand.vmem [shape: bf16[512,8], index: 5, kind: input, shape index: {}]   ;;  %s3309_s6 = inlined_call_operand.vmem [shape: f32[1,8], index: 6, kind: input, shape index: {}]   ;;  %s3310_s7 = inlined_call_operand.hbm [shape: f32[8,8,256], index: 7, kind: output, shape index: {}]  }
   0x1   :  { %14 = vsyncpa [#allocation3 + $0x1], 0  ;;  %s2505_s24 = smov 0   ;;  %s2507_s25 = smov 0  }
   0x2   :  { %s2509_s26 = smov 0   ;;  %s2511_s27 = smov 0  }
   0x3 LB: > { %s2526_s28 = sadd.s32 4294967295, %s2452_s27   ;;  %s2008_s29 = sadd.s32 4294967294, %s2452_s27   ;;  %s2452_s27 = sphi %s2511_s27, %s3326_s27   ;;  %s2448_s26 = sphi %s2509_s26, %s3325_s26   ;;  %s2444_s25 = sphi %s2507_s25, %s3324_s25   ;;  %s2440_s24 = sphi %s2505_s24, %s3323_s24  }
   0x4   : > { %s2530_s30 = sadd.s32 1, %s2452_s27   ;;  %s184_s8 = sadd.s32 1, %s2448_s26 }
   0x5   : > { %s181_s9 = ssub.s32 %s2452_s27, %s2530_s30  ;;  %p194_p0 = scmp.ne.s32.totalorder %s2448_s26, %s2444_s25 }
   0x6   : > { %p182_p1 = scmp.eq.s32.totalorder %s181_s9, 0  ;;  %p195_p2 = scmp.eq.s32.totalorder %s2526_s28, 1 }
   0x7   : > { %p200_p3 = scmp.ne.s32.totalorder %s2444_s25, %s2440_s24  ;;  %p201_p4 = scmp.eq.s32.totalorder %s2008_s29, 1 }
   0x8   : > { %s2541_s10 = scalar_select %p182_p1, %s2448_s26, %s184_s8  }
   0x9   : > { %p2543_p5 = por %p195_p2, %p194_p0  ;;  %p2547_p6 = por %p201_p4, %p200_p3 }
   0xa   : > { %p2011_p7 = scmp.ge.s32.totalorder %s2452_s27, 1  ;;  %p252_p8 = scmp.lt.s32.totalorder %s2452_s27, 3 }
   0xc   : > { %p253_p9 = pnand %p2011_p7, %p252_p8 }
   0xd   : > { %s2013_s17 = sshll.u32 (!%p253_p9), %s2526_s28, 2  ;;  %s286_s20 = sand.u32 (!%p253_p9), 1, %s2444_s25  }
   0xe   : > { %256 = sbr.rel (%p253_p9) target bundleno = 577 (0x241), region = 48  ;;  %p290_p10 = scmp.lt.s32.totalorder (!%p253_p9), %s2013_s17, 7 }
   0xf   : > { %s2012_s21 = sshll.u32 (!%p253_p9), %s286_s20, 6  ;;  %s2282_s23 = sshll.u32 (!%p253_p9), %s2526_s28, 6 }
  0x10   : > { %s2998_s22 = scalar_lea.vmem (!%p253_p9), [#allocation2], %s2012_s21  ;;  %s1930_s9 = scalar_lea.hbm (!%p253_p9), %s3310_s7, %s2282_s23 }
  0x11   : > { %s1931_s28 = sshll.u32 (!%p253_p9), %s2998_s22, 4  ;;  %s2410_s19 = scalar_lea.hbm (!%p253_p9), %s3310_s7, 128  ;;  %s1932_s28 = int_to_ptr.vmem [resolvable:$true] %s1931_s28 }
  0x13   : > { %v2043_v0 = vld [vmem:[%s3306_s3 + $0x20] sm:$0xf]  ;;  %v2247_v1 = vld [vmem:[%s3306_s3 + $0x2c] sm:$0xf0]  ;;  %v2245_v2 = vld [vmem:[%s3306_s3 + $0x24] sm:$0xf] }
  0x14   : > { %v2044_v3 = vor.u32 %v2247_v1, %v2043_v0  ;;  %v2045_v4 = vld [vmem:[%s3306_s3 + $0x30] sm:$0xf0]  ;;  %v2051_v5 = vld [vmem:[%s3306_s3 + $0x28] sm:$0xf]  ;;  %v2248_v6 = vld [vmem:[%s3306_s3 + $0x34] sm:$0xf0] }
  0x15   : > { %v2048_v7 = vor.u32 %v2245_v2, %v2045_v4  ;;  %v2052_v8 = vor.u32 %v2248_v6, %v2051_v5  ;;  %v2246_v9 = vld [vmem:[%s3306_s3 + $0x2c] sm:$0xf]  ;;  %v2053_v10 = vld [vmem:[%s3306_s3 + $0x38] sm:$0xf0]  ;;  %v2027_v11 = vld [vmem:[%s3306_s3] sm:$0xf] }
  0x16   : > { %388 = vmatpush.bf16.msra.mxu0 %v2044_v3  ;;  %v2056_v12 = vor.u32 %v2246_v9, %v2053_v10  ;;  %v2243_v13 = vld [vmem:[%s3306_s3 + $0xc] sm:$0xf0]  ;;  %v2241_v14 = vld [vmem:[%s3306_s3 + $0x4] sm:$0xf]  ;;  %v2029_v15 = vld [vmem:[%s3306_s3 + $0x10] sm:$0xf0] }
  0x17   : > { %407 = vmatpush.bf16.msra.mxu1 %v2048_v7  ;;  %426 = vmatpush.bf16.msra.mxu2 %v2052_v8  ;;  %v2028_v16 = vor.u32 %v2243_v13, %v2027_v11  ;;  %v2032_v17 = vor.u32 %v2241_v14, %v2029_v15  ;;  %v2035_v18 = vld [vmem:[%s3306_s3 + $0x8] sm:$0xf]  ;;  %v2244_v19 = vld [vmem:[%s3306_s3 + $0x14] sm:$0xf0]  ;;  %v2242_v20 = vld [vmem:[%s3306_s3 + $0xc] sm:$0xf] }
  0x18   : > { %445 = vmatpush.bf16.msra.mxu3 %v2056_v12  ;;  %v2036_v21 = vor.u32 %v2244_v19, %v2035_v18  ;;  %v2037_v22 = vld [vmem:[%s3306_s3 + $0x18] sm:$0xf0]  ;;  %s3328_s17 = smov (!%p290_p10, %s2013_s17), 7  ;;  %v2255_v28 = vld [vmem:[%s3308_s5 + $0x30] sm:$0xff]  ;;  %vm375_vm0 = vcmask 261120   ;;  %v2254_v32 = vld [vmem:[%s3308_s5 + $0x28] sm:$0xff] }
  0x19   : > { %v2256_v23 = vld [vmem:[%s3308_s5 + $0x38] sm:$0xff]  ;;  %v2040_v24 = vor.u32 %v2242_v20, %v2037_v22  ;;  %s2014_s14 = sshll.u32 %s3328_s17, 2  ;;  %v2263_v30 = vld [vmem:[%s3308_s5 + $0x70] sm:$0xff]  ;;  %v2262_v34 = vld [vmem:[%s3308_s5 + $0x68] sm:$0xff]  ;;  %s2016_s29 = sshll.u32 %s3328_s17, 3  ;;  %v2454_v5 = vmov 1  }
  0x1a   : > { %v2264_v25 = vld [vmem:[%s3308_s5 + $0x78] sm:$0xff]  ;;  %389 = vmatpush.bf16.msra.mxu0 %v2028_v16  ;;  %s293_s18 = scalar_lea.vmem %s3303_s0, %s2014_s14  ;;  %v2271_v31 = vld [vmem:[%s3308_s5 + $0xb0] sm:$0xff]  ;;  %v2270_v35 = vld [vmem:[%s3308_s5 + $0xa8] sm:$0xff]  ;;  %s299_s13 = scalar_lea.vmem %s3304_s1, %s2016_s29  ;;  %2334 = vset.pattern.permute.xlu1 %v2454_v5  ;;  %v2455_v12 = vmov 3  }
  0x1b   : > { %v2272_v26 = vld [vmem:[%s3308_s5 + $0xb8] sm:$0xff]  ;;  %408 = vmatpush.bf16.msra.mxu1 %v2032_v17  ;;  %427 = vmatpush.bf16.msra.mxu2 %v2036_v21  ;;  %v2239_v29 = vld [vmem:[%s293_s18] sm:$0xff]  ;;  %v2279_v33 = vld [vmem:[%s3308_s5 + $0xf0] sm:$0xff]  ;;  %s1918_s17 = scalar_lea.sflag [#allocation3], %s286_s20 }
  0x1c   : > { %v2280_v27 = vld [vmem:[%s3308_s5 + $0xf8] sm:$0xff]  ;;  %446 = vmatpush.bf16.msra.mxu3 %v2040_v24  ;;  %v2253_v36 = vld [vmem:[%s3308_s5 + $0x20] sm:$0xff]  ;;  %v2278_v37 = vld [vmem:[%s3308_s5 + $0xe8] sm:$0xff]  ;;  %2333 = vset.pattern.permute.xlu0 %v2454_v5 }
  0x1d   : > { %2057 = vmatmul.msk.bf16.vlgmr.msra.gmra.mxu0 %vm375_vm0, %v2239_v29  ;;  %v2261_v38 = vld [vmem:[%s3308_s5 + $0x60] sm:$0xff]  ;;  %v2240_v39 = vld [vmem:[%s293_s18 + $0x8] sm:$0xff]  ;;  %v2252_v40 = vld [vmem:[%s3308_s5 + $0x18] sm:$0xff]  ;;  %2335 = vset.pattern.permute.xlu2 %v2455_v12 }
  0x1e   : > { %742 = vmatpush.bf16.msrb.mxu0 %v2256_v23  ;;  %2059 = vmatmul.msk.bf16.vlgmr.msra.gmra.mxu1 %vm375_vm0, %v2239_v29  ;;  %v2260_v41 = vld [vmem:[%s3308_s5 + $0x58] sm:$0xff]  ;;  %v2269_v42 = vld [vmem:[%s3308_s5 + $0xa0] sm:$0xff]  ;;  %v2251_v44 = vld [vmem:[%s3308_s5 + $0x10] sm:$0xff] }
  0x1f   : > { %761 = vmatpush.bf16.msrb.mxu1 %v2264_v25  ;;  %780 = vmatpush.bf16.msrb.mxu2 %v2272_v26  ;;  %v2277_v43 = vld [vmem:[%s3308_s5 + $0xe0] sm:$0xff]  ;;  %v2259_v45 = vld [vmem:[%s3308_s5 + $0x50] sm:$0xff]  ;;  %v2268_v46 = vld [vmem:[%s3308_s5 + $0x98] sm:$0xff] }
  0x20   : > { %799 = vmatpush.bf16.msrb.mxu3 %v2280_v27  ;;  %2061 = vmatmul.msk.bf16.vlgmr.msra.gmra.mxu2 %vm375_vm0, %v2239_v29  ;;  %v2276_v47 = vld [vmem:[%s3308_s5 + $0xd8] sm:$0xff]  ;;  %v2250_v48 = vld [vmem:[%s3308_s5 + $0x8] sm:$0xff]  ;;  %v2267_v50 = vld [vmem:[%s3308_s5 + $0x90] sm:$0xff] }
  0x21   : > { %2063 = vmatmul.msk.bf16.vlgmr.msra.gmra.mxu3 %vm375_vm0, %v2239_v29  ;;  %v2258_v49 = vld [vmem:[%s3308_s5 + $0x48] sm:$0xff]  ;;  %v2275_v51 = vld [vmem:[%s3308_s5 + $0xd0] sm:$0xff]  ;;  %v2249_v52 = vld [vmem:[%s3308_s5] sm:$0xff] }
  0x22   : > { %743 = vmatpush.bf16.msrb.mxu0 %v2255_v28  ;;  %v2257_v53 = vld [vmem:[%s3308_s5 + $0x40] sm:$0xff]  ;;  %v2266_v54 = vld [vmem:[%s3308_s5 + $0x88] sm:$0xff]  ;;  %v2719_v1 = vld [vmem:[%s299_s13 + $0x10] sm:$0xff] }
  0x23   : > { %762 = vmatpush.bf16.msrb.mxu1 %v2263_v30  ;;  %781 = vmatpush.bf16.msrb.mxu2 %v2271_v31  ;;  %v2274_v55 = vld [vmem:[%s3308_s5 + $0xc8] sm:$0xff]  ;;  %v2265_v56 = vld [vmem:[%s3308_s5 + $0x80] sm:$0xff]  ;;  %v2729_v19 = vld [vmem:[%s299_s13 + $0x18] sm:$0xff] }
  0x24   : > { %800 = vmatpush.bf16.msrb.mxu3 %v2279_v33  ;;  %v2273_v57 = vld [vmem:[%s3308_s5 + $0xc0] sm:$0xff]  ;;  %834 = vperm.xlu1 %2334, %v2719_v1   ;;  %v2731_v20 = vld [vmem:[%s299_s13 + $0x8] sm:$0xff] }
  0x25   : > { %v315_v58 = vld [vmem:[%s3307_s4] sm:$0xf] }
  0x26   : > { %744 = vmatpush.bf16.msrb.mxu0 %v2254_v32  ;;  %v317_v61 = vperm.slane %v315_v58, 0  ;;  %v318_v62 = vperm.slane %v315_v58, 1  ;;  %v2721_v2 = vld [vmem:[%s299_s13] sm:$0xff]  ;;  %v319_v13 = vperm.slane %v315_v58, 2  ;;  %v320_v14 = vperm.slane %v315_v58, 3  ;;  %s1933_s13 = sshll.u32 %s1930_s9, 4  ;;  %s1934_s13 = int_to_ptr.hbm [resolvable:$true] %s1933_s13 }
  0x27   : > { %763 = vmatpush.bf16.msrb.mxu1 %v2262_v34  ;;  %782 = vmatpush.bf16.msrb.mxu2 %v2270_v35  ;;  %s2404_s14 = sshra.s32 %s1934_s13, 4  ;;  %s2405_s14 = int_to_ptr.hbm [resolvable:$true] %s2404_s14 }
  0x28   : > { %801 = vmatpush.bf16.msrb.mxu3 %v2278_v37  ;;  %828 = vperm.xlu0 %2333, %v2721_v2   ;;  %s2406_s15 = scalar_lea.hbm %s2405_s14, 64  ;;  %p2411_p0 = scmp.lt.s32.totalorder %s2405_s14, %s3310_s7 }
  0x29   : > { %848 = vperm.xlu2 %2335, %v2721_v2   ;;  %p2407_p11 = scmp.ne.s32.totalorder %s2405_s14, %s2406_s15  ;;  %p2412_p1 = scmp.lt.s32.totalorder %s2410_s19, %s2406_s15 }
  0x2a   : > { %745 = vmatpush.bf16.msrb.mxu0 %v2253_v36 }
  0x2b   : > { %764 = vmatpush.bf16.msrb.mxu1 %v2261_v38  ;;  %783 = vmatpush.bf16.msrb.mxu2 %v2269_v42  ;;  %p2408_p12 = pnand %p2407_p11, %p2543_p5  ;;  %p2413_p2 = por %p2412_p1, %p2411_p0 }
  0x2c   : > { %802 = vmatpush.bf16.msrb.mxu3 %v2277_v43  ;;  %837 = vperm.xlu1 %2334, %v2729_v19  }
  0x2d   : > { %2058 = vmatmul.msk.bf16.gmra.mxu0 %vm375_vm0, %v2240_v39  ;;  %p2409_p13 = pneg %p2408_p12 }
  0x2e   : > { %2060 = vmatmul.msk.bf16.gmra.mxu1 %vm375_vm0, %v2240_v39  ;;  %746 = vmatpush.bf16.msrb.mxu0 %v2252_v40 }
  0x2f   : > { %765 = vmatpush.bf16.msrb.mxu1 %v2260_v41  ;;  %784 = vmatpush.bf16.msrb.mxu2 %v2268_v46  ;;  %p2414_p3 = pnand %p2413_p2, %p2409_p13 }
  0x30   : > { %2062 = vmatmul.msk.bf16.gmra.mxu2 %vm375_vm0, %v2240_v39  ;;  %803 = vmatpush.bf16.msrb.mxu3 %v2276_v47 }
  0x31   : > { %2064 = vmatmul.msk.bf16.gmra.mxu3 %vm375_vm0, %v2240_v39  ;;  %831 = vperm.xlu0 %2333, %v2731_v20  }
  0x32   : > { %747 = vmatpush.bf16.msrb.mxu0 %v2251_v44  ;;  %851 = vperm.xlu2 %2335, %v2731_v20  }
  0x33   : > { %766 = vmatpush.bf16.msrb.mxu1 %v2259_v45  ;;  %785 = vmatpush.bf16.msrb.mxu2 %v2267_v50  ;;  %v2456_v45 = vmov 0  }
  0x34   : > { %804 = vmatpush.bf16.msrb.mxu3 %v2275_v51  ;;  %2337 = vset.pattern.permute.xlu1 %v2455_v12 }
  0x35   : > { %857 = vperm.xlu1 %2337, %v2729_v19  }
  0x36   : > { %748 = vmatpush.bf16.msrb.mxu0 %v2250_v48 }
  0x37   : > { %767 = vmatpush.bf16.msrb.mxu1 %v2258_v49  ;;  %786 = vmatpush.bf16.msrb.mxu2 %v2266_v54 }
  0x38   : > { %805 = vmatpush.bf16.msrb.mxu3 %v2274_v55 }
  0x39   : > { %2336 = vset.pattern.permute.xlu0 %v2455_v12 }
  0x3a   : > { %749 = vmatpush.bf16.msrb.mxu0 %v2249_v52  ;;  %854 = vperm.xlu0 %2336, %v2719_v1  }
  0x3b   : > { %768 = vmatpush.bf16.msrb.mxu1 %v2257_v53  ;;  %787 = vmatpush.bf16.msrb.mxu2 %v2265_v56 }
  0x3c   : > { %806 = vmatpush.bf16.msrb.mxu3 %v2273_v57  ;;  %2338 = vset.pattern.permute.xlu2 %v2456_v45 }
  0x3d   : > { %878 = vperm.xlu2 %2338, %v2721_v2   ;;  %2339 = vset.pattern.permute.xlu1 %v2456_v45 }
  0x3e   : > { %881 = vperm.xlu1 %2339, %v2731_v20  }
  0x42   : > { %2340 = vset.pattern.permute.xlu0 %v2456_v45 }
  0x43   : > { %887 = vperm.xlu0 %2340, %v2729_v19  }
  0x45   : > { %884 = vperm.xlu2 %2338, %v2719_v1  }
  0x9a   : > { %v391_v59 = vpop.f32.mrf.mxu0 }
  0x9b   : > { %v410_v60 = vpop.f32.mrf.mxu1  ;;  %v392_v63 = vadd.f32 %v391_v59, %v317_v61 }
  0x9c   : > { %v411_v0 = vadd.f32 %v410_v60, %v318_v62 }
  0x9d   : > { %v458_v8 = vmax.f32 %v392_v63, 0.0  ;;  %v2757_v63 = vld [vmem:[%s3309_s6] ss:$0 sm:$0xff] }
  0x9e   : > { %v459_v9 = vmax.f32 %v411_v0, 0.0  ;;  %v818_v0 = vld [vmem:[%s3305_s2] sm:$0x3] }
  0xa2   : > { %v393_v6 = vpop.f32.mrf.mxu0 }
  0xa3   : > { %v429_v3 = vpop.f32.mrf.mxu2  ;;  %v412_v7 = vpop.f32.mrf.mxu1  ;;  %v394_v10 = vadd.f32 %v393_v6, %v317_v61  ;;  %v2766_v6 = vperm.slane %v818_v0, 0 }
  0xa4   : > { %v448_v4 = vpop.f32.mrf.mxu3  ;;  %v413_v11 = vadd.f32 %v412_v7, %v318_v62  ;;  %v430_v21 = vadd.f32 %v429_v3, %v319_v13  ;;  %v2764_v3 = vpop.permute.xlu2 %848 }
  0xa5   : > { %v462_v15 = vmax.f32 %v394_v10, 0.0  ;;  %v449_v22 = vadd.f32 %v448_v4, %v320_v14 }
  0xa6   : > { %v463_v16 = vmax.f32 %v413_v11, 0.0  ;;  %v460_v29 = vmax.f32 %v430_v21, 0.0 }
  0xa7   : > { %v474_v17 = vpack.c.bf16 %v462_v15, %v458_v8  ;;  %v461_v30 = vmax.f32 %v449_v22, 0.0  ;;  %v2193_v22 = vld [vmem:[%s3305_s2 + $0x2] sm:$0x3] }
  0xa8   : > { %v475_v18 = vpack.c.bf16 %v463_v16, %v459_v9  ;;  %v2779_v16 = vpop.permute.xlu0 %828 }
  0xa9   : > { %750 = vmatmul.bf16.vlgmr.msrb.gmra.mxu0 %v474_v17 }
  0xaa   : > { %769 = vmatmul.bf16.vlgmr.msrb.gmra.mxu1 %v475_v18  ;;  %v396_v27 = vpop.f32.mrf.mxu0 }
  0xab   : > { %v431_v23 = vpop.f32.mrf.mxu2  ;;  %v415_v28 = vpop.f32.mrf.mxu1  ;;  %v397_v35 = vadd.f32 %v396_v27, %v317_v61 }
  0xac   : > { %v450_v24 = vpop.f32.mrf.mxu3  ;;  %v432_v25 = vadd.f32 %v431_v23, %v319_v13  ;;  %v416_v36 = vadd.f32 %v415_v28, %v318_v62  ;;  %v2775_v11 = vpop.permute.xlu2 %851 }
  0xad   : > { %v451_v26 = vadd.f32 %v450_v24, %v320_v14  ;;  %v466_v41 = vmax.f32 %v397_v35, 0.0 }
  0xae   : > { %v464_v31 = vmax.f32 %v432_v25, 0.0  ;;  %v467_v42 = vmax.f32 %v416_v36, 0.0  ;;  %v2798_v25 = vperm.slane %v2193_v22, 0 }
  0xaf   : > { %v465_v32 = vmax.f32 %v451_v26, 0.0  ;;  %v2800_v26 = vperm.slane %v2193_v22, 1 }
  0xb0   : > { %v476_v33 = vpack.c.bf16 %v464_v31, %v460_v29  ;;  %v2802_v27 = vpop.permute.xlu0 %831  ;;  %v2458_v29 = vmov 5   ;;  %v2459_v31 = vmov 4  }
  0xb1   : > { %v477_v34 = vpack.c.bf16 %v465_v32, %v461_v30 }
  0xb2   : > { %788 = vmatmul.bf16.vlgmr.msrb.gmra.mxu2 %v476_v33  ;;  %v398_v39 = vpop.f32.mrf.mxu0 }
  0xb3   : > { %807 = vmatmul.bf16.vlgmr.msrb.gmra.mxu3 %v477_v34  ;;  %v434_v37 = vpop.f32.mrf.mxu2  ;;  %v417_v40 = vpop.f32.mrf.mxu1  ;;  %v399_v43 = vadd.f32 %v398_v39, %v317_v61 }
  0xb4   : > { %v453_v38 = vpop.f32.mrf.mxu3  ;;  %v418_v44 = vadd.f32 %v417_v40, %v318_v62  ;;  %v435_v48 = vadd.f32 %v434_v37, %v319_v13  ;;  %v2457_v62 = vmov 2  }
  0xb5   : > { %v470_v46 = vmax.f32 %v399_v43, 0.0  ;;  %v454_v49 = vadd.f32 %v453_v38, %v320_v14  ;;  %2341 = vset.pattern.permute.xlu1 %v2457_v62  ;;  %2342 = vset.pattern.permute.xlu2 %v2457_v62 }
  0xb6   : > { %v471_v47 = vmax.f32 %v418_v44, 0.0  ;;  %v468_v54 = vmax.f32 %v435_v48, 0.0  ;;  %906 = vperm.xlu1 %2341, %v2721_v2   ;;  %909 = vperm.xlu2 %2342, %v2731_v20   ;;  %v2762_v2 = vpop.permute.xlu1 %834  ;;  %v2781_v20 = vpop.permute.xlu2 %878 }
  0xb7   : > { %v478_v50 = vpack.c.bf16 %v470_v46, %v466_v41  ;;  %v469_v55 = vmax.f32 %v454_v49, 0.0  ;;  %vm843_vm1 = vcmp.ge.s32.totalorder %v2766_v6, %v2762_v2  ;;  %v2460_v41 = vmov 7  }
  0xb8   : > { %v479_v51 = vpack.c.bf16 %v471_v47, %v467_v42  ;;  %v855_v40 = vpop.permute.xlu0 %854  ;;  %v2461_v46 = vmov 6  }
  0xb9   : > { %755 = vmatmul.bf16.gmra.mxu0 %v478_v50  ;;  %vm863_vm11 = vcmp.lt.s32.totalorder %v2766_v6, %v855_v40 }
  0xba   : > { %774 = vmatmul.bf16.gmra.mxu1 %v479_v51  ;;  %vm871_vm13 = vmand %vm843_vm1, %vm863_vm11 }
  0xbb   : > { %v436_v52 = vpop.f32.mrf.mxu2 }
  0xbc   : > { %v455_v53 = vpop.f32.mrf.mxu3  ;;  %v437_v56 = vadd.f32 %v436_v52, %v319_v13 }
  0xbd   : > { %v456_v57 = vadd.f32 %v455_v53, %v320_v14 }
  0xbe   : > { %v472_v58 = vmax.f32 %v437_v56, 0.0  ;;  %912 = vperm.xlu1 %2341, %v2719_v1   ;;  %915 = vperm.xlu2 %2342, %v2729_v19   ;;  %v2768_v1 = vperm.slane %v818_v0, 1  ;;  %v838_v10 = vpop.permute.xlu1 %837  ;;  %v885_v34 = vpop.permute.xlu2 %884 }
  0xbf   : > { %v473_v59 = vmax.f32 %v456_v57, 0.0  ;;  %vm845_vm3 = vcmp.ge.s32.totalorder %v2766_v6, %v838_v10  ;;  %vm893_vm9 = vcmp.ge.s32.totalorder %v2798_v25, %v885_v34  ;;  %vm894_vm10 = vcmp.ge.s32.totalorder %v2800_v26, %v885_v34 }
  0xc0   : > { %v480_v60 = vpack.c.bf16 %v472_v58, %v468_v54  ;;  %vm844_vm2 = vcmp.ge.s32.totalorder %v2768_v1, %v2762_v2  ;;  %vm846_vm4 = vcmp.ge.s32.totalorder %v2768_v1, %v838_v10  ;;  %vm864_vm12 = vcmp.lt.s32.totalorder %v2768_v1, %v855_v40  ;;  %v888_v52 = vpop.permute.xlu0 %887  ;;  %vm2835_vm15 = vmand %vm871_vm13, %vm893_vm9 }
  0xc1   : > { %v481_v61 = vpack.c.bf16 %v473_v59, %v469_v55  ;;  %vm872_vm14 = vmand %vm844_vm2, %vm864_vm12  ;;  %vm895_vm0 = vcmp.ge.s32.totalorder %v2798_v25, %v888_v52  ;;  %vm896_vm1 = vcmp.ge.s32.totalorder %v2800_v26, %v888_v52  ;;  %v2462_v58 = vmov 0.0  }
  0xc2   : > { %793 = vmatmul.bf16.gmra.mxu2 %v480_v60  ;;  %vm902_vm2 = vmand %vm872_vm14, %vm894_vm10  ;;  %vm860_vm13 = vcmp.lt.s32.totalorder %v2768_v1, %v2764_v3  ;;  %vm840_vm14 = vcmp.ge.s32.totalorder %v2768_v1, %v2779_v16 }
  0xc3   : > { %812 = vmatmul.bf16.gmra.mxu3 %v481_v61 }
  0xc6   : > { %2343 = vset.pattern.permute.xlu1 %v2454_v5  ;;  %v858_v19 = vpop.permute.xlu1 %857 }
  0xc7   : > { %vm865_vm5 = vcmp.lt.s32.totalorder %v2766_v6, %v858_v19  ;;  %vm866_vm6 = vcmp.lt.s32.totalorder %v2768_v1, %v858_v19 }
  0xc8   : > { %vm2785_vm7 = vmand %vm845_vm3, %vm865_vm5 }
  0xc9   : > { %vm2794_vm8 = vmand %vm846_vm4, %vm866_vm6 }
  0xca   : > { %vm2849_vm3 = vmand %vm2785_vm7, %vm895_vm0  ;;  %vm839_vm0 = vcmp.ge.s32.totalorder %v2766_v6, %v2779_v16 }
  0xcb   : > { %vm904_vm6 = vmand %vm2794_vm8, %vm896_vm1 }
  0xcc   : > { %vm868_vm1 = vmand %vm840_vm14, %vm860_vm13  ;;  %vm842_vm13 = vcmp.ge.s32.totalorder %v2768_v1, %v2802_v27 }
  0xce   : > { %v2808_v33 = vpop.permute.xlu1 %881 }
 0x110   : > { %v2825_v48 = vpop.permute.xlu2 %909 }
 0x118   : > { %v916_v55 = vpop.permute.xlu2 %915 }
 0x119   : > { %vm923_vm9 = vcmp.lt.s32.totalorder %v2798_v25, %v916_v55  ;;  %vm924_vm10 = vcmp.lt.s32.totalorder %v2800_v26, %v916_v55 }
 0x11a   : > { %vm931_vm8 = vmand %vm2849_vm3, %vm923_vm9 }
 0x11b   : > { %vm932_vm12 = vmand %vm904_vm6, %vm924_vm10  ;;  %v2873_v2 = vsel %vm931_vm8, 1.0, %v2462_v58 }
 0x126   : > { %v751_v4 = vpop.f32.mrf.mxu0 }
 0x127   : > { %v752_v7 = vadd.f32 %v2757_v63, %v751_v4  ;;  %v770_v8 = vpop.f32.mrf.mxu1  ;;  %v2876_v4 = vsel %vm932_vm12, 1.0, %v2462_v58  ;;  %vm862_vm12 = vcmp.lt.s32.totalorder %v2768_v1, %v2775_v11 }
 0x128   : > { %v2823_v47 = vpop.permute.xlu1 %906 }
 0x129   : > { %v771_v9 = vadd.f32 %v770_v8, %v752_v7  ;;  %vm918_vm6 = vcmp.lt.s32.totalorder %v2800_v26, %v2823_v47  ;;  %vm917_vm10 = vcmp.lt.s32.totalorder %v2798_v25, %v2823_v47 }
 0x12e   : > { %v753_v18 = vpop.f32.mrf.mxu0 }
 0x12f   : > { %v772_v24 = vpop.f32.mrf.mxu1  ;;  %v754_v28 = vadd.f32 %v2757_v63, %v753_v18 }
 0x130   : > { %v913_v53 = vpop.permute.xlu1 %912 }
 0x131   : > { %v773_v35 = vadd.f32 %v772_v24, %v754_v28  ;;  %vm921_vm4 = vcmp.lt.s32.totalorder %v2798_v25, %v913_v53  ;;  %vm922_vm5 = vcmp.lt.s32.totalorder %v2800_v26, %v913_v53 }
 0x132   : > { %vm929_vm7 = vmand %vm2835_vm15, %vm921_vm4  ;;  %vm859_vm15 = vcmp.lt.s32.totalorder %v2766_v6, %v2764_v3  ;;  %vm889_vm4 = vcmp.ge.s32.totalorder %v2798_v25, %v2781_v20 }
 0x133   : > { %vm930_vm11 = vmand %vm902_vm2, %vm922_vm5  ;;  %v2864_v59 = vsel %vm929_vm7, 1.0, %v2462_v58  ;;  %vm890_vm2 = vcmp.ge.s32.totalorder %v2800_v26, %v2781_v20  ;;  %vm861_vm7 = vcmp.lt.s32.totalorder %v2766_v6, %v2775_v11 }
 0x134   : > { %v2868_v61 = vsel %vm930_vm11, 1.0, %v2462_v58  ;;  %vm867_vm3 = vmand %vm839_vm0, %vm859_vm15  ;;  %vm841_vm11 = vcmp.ge.s32.totalorder %v2766_v6, %v2802_v27  ;;  %vm891_vm0 = vcmp.ge.s32.totalorder %v2798_v25, %v2808_v33  ;;  %v973_v21 = vrot.slane %v2864_v59, 4 }
 0x135   : > { %v789_v13 = vpop.f32.mrf.mxu2  ;;  %vm898_vm5 = vmand %vm868_vm1, %vm890_vm2  ;;  %vm892_vm2 = vcmp.ge.s32.totalorder %v2800_v26, %v2808_v33  ;;  %v979_v22 = vrot.slane %v2868_v61, 4 }
 0x136   : > { %v790_v14 = vadd.f32 %v789_v13, %v771_v9  ;;  %v808_v15 = vpop.f32.mrf.mxu3  ;;  %v756_v32 = vpop.f32.mrf.mxu0  ;;  %vm897_vm9 = vmand %vm867_vm3, %vm889_vm4  ;;  %vm919_vm4 = vcmp.lt.s32.totalorder %v2798_v25, %v2825_v48 }
 0x137   : > { %v757_v36 = vadd.f32 %v2757_v63, %v756_v32  ;;  %v775_v39 = vpop.f32.mrf.mxu1  ;;  %vm926_vm8 = vmand %vm898_vm5, %vm918_vm6  ;;  %vm920_vm6 = vcmp.lt.s32.totalorder %v2800_v26, %v2825_v48  ;;  %v985_v26 = vrot.slane %v2873_v2, 4  ;;  %v980_v28 = vadd.f32 %v2868_v61, %v979_v22 }
 0x138   : > { %v809_v17 = vadd.f32 %v808_v15, %v790_v14  ;;  %vm925_vm14 = vmand %vm897_vm9, %vm917_vm10 }
 0x139   : > { %v776_v42 = vadd.f32 %v775_v39, %v757_v36  ;;  %vm869_vm15 = vmand %vm841_vm11, %vm861_vm7  ;;  %v981_v40 = vrot.slane %v980_v28, 2  ;;  %vm1109_vm7 = vcmask 1040384  }
 0x13a   : > { %1246 = vperm.xlu2 %2342, %v809_v17   ;;  %1134 = vperm.xlu1 %2343, %v809_v17   ;;  %vm870_vm1 = vmand %vm842_vm13, %vm862_vm12 }
 0x13b   : > { %1015 = vperm.xlu0 %2340, %v809_v17   ;;  %vm899_vm3 = vmand %vm869_vm15, %vm891_vm0 }
 0x13c   : > { %vm900_vm5 = vmand %vm870_vm1, %vm892_vm2 }
 0x13d   : > { %v791_v30 = vpop.f32.mrf.mxu2  ;;  %vm927_vm9 = vmand %vm899_vm3, %vm919_vm4 }
 0x13e   : > { %v792_v37 = vadd.f32 %v791_v30, %v773_v35  ;;  %v810_v38 = vpop.f32.mrf.mxu3  ;;  %v758_v57 = vpop.f32.mrf.mxu0  ;;  %vm928_vm10 = vmand %vm900_vm5, %vm920_vm6  ;;  %v2950_v13 = vsel %vm927_vm9, 1.0, %v2462_v58  ;;  %v991_v30 = vrot.slane %v2876_v4, 4  ;;  %v986_v35 = vadd.f32 %v2873_v2, %v985_v26 }
 0x13f   : > { %v759_v60 = vadd.f32 %v2757_v63, %v758_v57  ;;  %v777_v0 = vpop.f32.mrf.mxu1  ;;  %v2954_v15 = vsel %vm928_vm10, 1.0, %v2462_v58  ;;  %v961_v16 = vrot.slane %v2950_v13, 4 }
 0x140   : > { %v2816_v44 = vadd.f32 %v810_v38, %v792_v37  ;;  %v987_v52 = vrot.slane %v986_v35, 2 }
 0x141   : > { %v778_v7 = vadd.f32 %v777_v0, %v759_v60  ;;  %v962_v19 = vadd.f32 %v2950_v13, %v961_v16 }
 0x142   : > { %2346 = vset.pattern.permute.xlu2 %v2458_v29  ;;  %2344 = vset.pattern.permute.xlu1 %v2455_v12 }
 0x143   : > { %2345 = vset.pattern.permute.xlu0 %v2459_v31  ;;  %1582 = vperm.xlu2 %2346, %v809_v17   ;;  %v963_v25 = vrot.slane %v962_v19, 2 }
 0x144   : > { %1358 = vperm.xlu1 %2344, %v809_v17   ;;  %1470 = vperm.xlu0 %2345, %v809_v17  }
 0x145   : > { %v794_v43 = vpop.f32.mrf.mxu2  ;;  %v964_v34 = vadd.f32 %v963_v25, %v962_v19 }
 0x146   : > { %v795_v49 = vadd.f32 %v794_v43, %v776_v42  ;;  %v813_v50 = vpop.f32.mrf.mxu3  ;;  %v992_v42 = vadd.f32 %v2876_v4, %v991_v30 }
 0x148   : > { %v2831_v51 = vadd.f32 %v813_v50, %v795_v49  ;;  %v965_v50 = vrot.slane %v964_v34, 1  ;;  %v993_v57 = vrot.slane %v992_v42, 2 }
 0x14a   : > { %v966_v0 = vadd.f32 %v965_v50, %v964_v34 }
 0x14b   : > { %2348 = vset.pattern.permute.xlu2 %v2460_v41 }
 0x14c   : > { %2347 = vset.pattern.permute.xlu1 %v2461_v46  ;;  %2354 = vset.pattern.permute.xlu0 %v2458_v29 }
 0x14d   : > { %1806 = vperm.xlu2 %2348, %v809_v17   ;;  %1694 = vperm.xlu1 %2347, %v809_v17   ;;  %v796_v63 = vpop.f32.mrf.mxu2 }
 0x14e   : > { %1586 = vperm.xlu0 %2354, %v2816_v44   ;;  %v797_v8 = vadd.f32 %v796_v63, %v778_v7  ;;  %v815_v9 = vpop.f32.mrf.mxu3  ;;  %v988_v7 = vadd.f32 %v987_v52, %v986_v35 }
 0x150   : > { %v2884_v10 = vadd.f32 %v815_v9, %v797_v8  ;;  %v989_v19 = vrot.slane %v988_v7, 1 }
 0x155   : > { %2350 = vset.pattern.permute.xlu2 %v2454_v5  ;;  %2349 = vset.pattern.permute.xlu1 %v2456_v45 }
 0x156   : > { %2357 = vset.pattern.permute.xlu0 %v2454_v5  ;;  %1138 = vperm.xlu2 %2350, %v2816_v44  }
 0x157   : > { %1020 = vperm.xlu1 %2349, %v2816_v44   ;;  %1142 = vperm.xlu0 %2357, %v2831_v51  }
 0x15e   : > { %2352 = vset.pattern.permute.xlu2 %v2455_v12 }
 0x15f   : > { %2351 = vset.pattern.permute.xlu1 %v2457_v62  ;;  %2362 = vset.pattern.permute.xlu0 %v2461_v46 }
 0x160   : > { %1362 = vperm.xlu2 %2352, %v2816_v44   ;;  %1250 = vperm.xlu1 %2351, %v2816_v44  }
 0x161   : > { %1702 = vperm.xlu0 %2362, %v2831_v51  }
 0x168   : > { %2355 = vset.pattern.permute.xlu2 %v2461_v46  ;;  %2353 = vset.pattern.permute.xlu1 %v2459_v31 }
 0x169   : > { %2363 = vset.pattern.permute.xlu0 %v2456_v45  ;;  %1698 = vperm.xlu2 %2355, %v2816_v44  }
 0x16a   : > { %1474 = vperm.xlu1 %2353, %v2816_v44   ;;  %1030 = vperm.xlu0 %2363, %v2884_v10  }
 0x171   : > { %2356 = vset.pattern.permute.xlu2 %v2456_v45  ;;  %v2929_v45 = vsel %vm926_vm8, 1.0, %v2462_v58 }
 0x172   : > { %2359 = vset.pattern.permute.xlu1 %v2455_v12  ;;  %2365 = vset.pattern.permute.xlu0 %v2457_v62  ;;  %v955_v3 = vrot.slane %v2929_v45, 4 }
 0x173   : > { %1025 = vperm.xlu2 %2356, %v2831_v51   ;;  %1366 = vperm.xlu1 %2359, %v2831_v51  }
 0x174   : > { %1258 = vperm.xlu0 %2365, %v2884_v10   ;;  %v956_v1 = vadd.f32 %v2929_v45, %v955_v3 }
 0x176   : > { %v957_v14 = vrot.slane %v956_v1, 2 }
 0x178   : > { %v958_v18 = vadd.f32 %v957_v14, %v956_v1 }
 0x17a   : > { %v959_v23 = vrot.slane %v958_v18, 1 }
 0x17b   : > { %2358 = vset.pattern.permute.xlu2 %v2457_v62  ;;  %2361 = vset.pattern.permute.xlu1 %v2458_v29  ;;  %v2936_v62 = vsel %vm925_vm14, 1.0, %v2462_v58 }
 0x17c   : > { %2372 = vset.pattern.permute.xlu0 %v2460_v41  ;;  %1254 = vperm.xlu2 %2358, %v2831_v51   ;;  %v949_v6 = vrot.slane %v2936_v62, 4 }
 0x17d   : > { %1590 = vperm.xlu1 %2361, %v2831_v51   ;;  %1818 = vperm.xlu0 %2372, %v2884_v10  }
 0x17e   : > { %v950_v11 = vadd.f32 %v2936_v62, %v949_v6 }
 0x180   : > { %v951_v17 = vrot.slane %v950_v11, 2 }
 0x182   : > { %v952_v20 = vadd.f32 %v951_v17, %v950_v11  ;;  %v994_v11 = vadd.f32 %v993_v57, %v992_v42 }
 0x184   : > { %2360 = vset.pattern.permute.xlu2 %v2459_v31  ;;  %v953_v27 = vrot.slane %v952_v20, 1 }
 0x185   : > { %2364 = vset.pattern.permute.xlu1 %v2454_v5  ;;  %1478 = vperm.xlu2 %2360, %v2831_v51   ;;  %v967_v5 = vrot.slane %v2954_v15, 4 }
 0x186   : > { %1146 = vperm.xlu1 %2364, %v2884_v10   ;;  %v954_v38 = vadd.f32 %v953_v27, %v952_v20  ;;  %v1118_v20 = vlaneseq }
 0x187   : > { %v968_v24 = vadd.f32 %v2954_v15, %v967_v5 }
 0x188   : > { %v997_v55 = vmax.f32 %v954_v38, 1.0  ;;  %vm2992_vm11 = vcmp.lt.s32.totalorder %v1118_v20, 256 }
 0x189   : > { %v969_v32 = vrot.slane %v968_v24, 2 }
 0x18b   : > { %v970_v49 = vadd.f32 %v969_v32, %v968_v24  ;;  %v999_v24 = vmax.f32 %v966_v0, 1.0 }
 0x18d   : > { %2366 = vset.pattern.permute.xlu2 %v2455_v12  ;;  %v974_v12 = vadd.f32 %v2864_v59, %v973_v21 }
 0x18e   : > { %2367 = vset.pattern.permute.xlu1 %v2459_v31  ;;  %1370 = vperm.xlu2 %2366, %v2884_v10   ;;  %v960_v31 = vadd.f32 %v959_v23, %v958_v18 }
 0x18f   : > { %1482 = vperm.xlu1 %2367, %v2884_v10   ;;  %v975_v39 = vrot.slane %v974_v12, 2 }
 0x190   : > { %v998_v48 = vmax.f32 %v960_v31, 1.0 }
 0x191   : > { %v976_v56 = vadd.f32 %v975_v39, %v974_v12 }
 0x192   : > { %2374 = vrcp.f32 %v998_v48 }
 0x193   : > { %2376 = vrcp.f32 %v997_v55 }
 0x194   : > { %v1247_v33 = vpop.permute.xlu2 %1246  ;;  %2378 = vrcp.f32 %v999_v24 }
 0x195   : > { %v1261_v36 = vmul.f32 %v2936_v62, %v1247_v33  ;;  %v1262_v37 = vmul.f32 %v2929_v45, %v1247_v33  ;;  %v990_v33 = vadd.f32 %v989_v19, %v988_v7 }
 0x196   : > { %2368 = vset.pattern.permute.xlu2 %v2458_v29  ;;  %v982_v29 = vadd.f32 %v981_v40, %v980_v28 }
 0x197   : > { %2369 = vset.pattern.permute.xlu1 %v2461_v46  ;;  %1594 = vperm.xlu2 %2368, %v2884_v10   ;;  %v1269_v43 = vrot.slane %v1261_v36, 4  ;;  %v1275_v47 = vrot.slane %v1262_v37, 4  ;;  %v971_v46 = vrot.slane %v970_v49, 1  ;;  %v1003_v52 = vmax.f32 %v990_v33, 1.0 }
 0x198   : > { %1706 = vperm.xlu1 %2369, %v2884_v10   ;;  %v977_v10 = vrot.slane %v976_v56, 1  ;;  %v983_v1 = vrot.slane %v982_v29, 1  ;;  %v2985_v23 = vpop.eup %2374 }
 0x199   : > { %v1270_v53 = vadd.f32 %v1269_v43, %v1261_v36  ;;  %v1276_v54 = vadd.f32 %v1275_v47, %v1262_v37  ;;  %v972_v17 = vadd.f32 %v971_v46, %v970_v49  ;;  %v2990_v28 = vpop.eup %2376 }
 0x19a   : > { %v978_v27 = vadd.f32 %v977_v10, %v976_v56  ;;  %v984_v12 = vadd.f32 %v983_v1, %v982_v29  ;;  %v3005_v57 = vpop.eup %2378 }
 0x19b   : > { %v1271_v58 = vrot.slane %v1270_v53, 2  ;;  %v1277_v60 = vrot.slane %v1276_v54, 2  ;;  %v1000_v30 = vmax.f32 %v972_v17, 1.0 }
 0x19c   : > { %v1001_v38 = vmax.f32 %v978_v27, 1.0  ;;  %v1002_v39 = vmax.f32 %v984_v12, 1.0 }
 0x19d   : > { %v1272_v63 = vadd.f32 %v1271_v58, %v1270_v53  ;;  %v1278_v8 = vadd.f32 %v1277_v60, %v1276_v54  ;;  %v1583_v9 = vpop.permute.xlu2 %1582  ;;  %2380 = vrcp.f32 %v1000_v30 }
 0x19e   : > { %v1597_v3 = vmul.f32 %v2936_v62, %v1583_v9  ;;  %v1598_v6 = vmul.f32 %v2929_v45, %v1583_v9  ;;  %2382 = vrcp.f32 %v1001_v38 }
 0x19f   : > { %v1273_v14 = vrot.slane %v1272_v63, 1  ;;  %v1279_v16 = vrot.slane %v1278_v8, 1  ;;  %2371 = vset.pattern.permute.xlu2 %v2460_v41  ;;  %2384 = vrcp.f32 %v1002_v39 }
 0x1a0   : > { %2370 = vset.pattern.permute.xlu1 %v2460_v41  ;;  %1814 = vperm.xlu2 %2371, %v2831_v51   ;;  %v1605_v18 = vrot.slane %v1597_v3, 4  ;;  %v1611_v5 = vrot.slane %v1598_v6, 4  ;;  %v995_v41 = vrot.slane %v994_v11, 1  ;;  %2386 = vrcp.f32 %v1003_v52 }
 0x1a1   : > { %v1274_v21 = vadd.f32 %v1273_v14, %v1272_v63  ;;  %v1280_v22 = vadd.f32 %v1279_v16, %v1278_v8  ;;  %1810 = vperm.xlu1 %2370, %v2816_v44  }
 0x1a2   : > { %v1606_v25 = vadd.f32 %v1605_v18, %v1597_v3  ;;  %v1612_v26 = vadd.f32 %v1611_v5, %v1598_v6  ;;  %v996_v40 = vadd.f32 %v995_v41, %v994_v11 }
 0x1a3   : > { %v1318_v51 = vmul.f32 %v2985_v23, %v1280_v22  ;;  %v1317_v34 = vmul.f32 %v2990_v28, %v1274_v21  ;;  %v3012_v11 = vpop.eup %2380 }
 0x1a4   : > { %v1607_v31 = vrot.slane %v1606_v25, 2  ;;  %v1613_v32 = vrot.slane %v1612_v26, 2  ;;  %v1004_v29 = vmax.f32 %v996_v40, 1.0  ;;  %v3016_v22 = vpop.eup %2382 }
 0x1a5   : > { %v1333_v35 = vrot.slane %v1318_v51, 7  ;;  %v3022_v12 = vpop.eup %2384 }
 0x1a6   : > { %v1608_v36 = vadd.f32 %v1607_v31, %v1606_v25  ;;  %v1614_v37 = vadd.f32 %v1613_v32, %v1612_v26  ;;  %2388 = vrcp.f32 %v1004_v29  ;;  %v3025_v32 = vpop.eup %2386 }
 0x1a7   : > { %v1337_v42 = vsel %vm1109_vm7, %v1317_v34, %v1333_v35  ;;  %v1807_v43 = vpop.permute.xlu2 %1806 }
 0x1a8   : > { %2209 = vst.msk [vmem:[%s2998_s22 + $0x2] ss:$8 sm:$0x3] %vm2992_vm11, %v1337_v42  ;;  %v1609_v47 = vrot.slane %v1608_v36, 1  ;;  %v1615_v48 = vrot.slane %v1614_v37, 1  ;;  %v1821_v49 = vmul.f32 %v2936_v62, %v1807_v43  ;;  %v1822_v50 = vmul.f32 %v2929_v45, %v1807_v43 }
 0x1aa   : > { %v1610_v53 = vadd.f32 %v1609_v47, %v1608_v36  ;;  %v1616_v54 = vadd.f32 %v1615_v48, %v1614_v37  ;;  %v1829_v55 = vrot.slane %v1821_v49, 4  ;;  %v1835_v56 = vrot.slane %v1822_v50, 4 }
 0x1ac   : > { %v1654_v58 = vmul.f32 %v2985_v23, %v1616_v54  ;;  %v1830_v60 = vadd.f32 %v1829_v55, %v1821_v49  ;;  %v1836_v46 = vadd.f32 %v1835_v56, %v1822_v50  ;;  %v1135_v0 = vpop.permute.xlu1 %1134  ;;  %v1653_v7 = vmul.f32 %v2990_v28, %v1610_v53  ;;  %v3027_v42 = vpop.eup %2388 }
 0x1ad   : > { %v1149_v63 = vmul.f32 %v2936_v62, %v1135_v0  ;;  %v1150_v8 = vmul.f32 %v2929_v45, %v1135_v0  ;;  %v1016_v9 = vpop.permute.xlu0 %1015 }
 0x1ae   : > { %v1669_v10 = vrot.slane %v1654_v58, 7  ;;  %v1831_v3 = vrot.slane %v1830_v60, 2  ;;  %v1837_v6 = vrot.slane %v1836_v46, 2  ;;  %v1033_v1 = vmul.f32 %v2936_v62, %v1016_v9 }
 0x1af   : > { %v1157_v14 = vrot.slane %v1149_v63, 4  ;;  %v1163_v16 = vrot.slane %v1150_v8, 4  ;;  %v1034_v17 = vmul.f32 %v2929_v45, %v1016_v9 }
 0x1b0   : > { %v1673_v18 = vsel %vm1109_vm7, %v1653_v7, %v1669_v10  ;;  %v1832_v5 = vadd.f32 %v1831_v3, %v1830_v60  ;;  %v1838_v19 = vadd.f32 %v1837_v6, %v1836_v46  ;;  %v1041_v20 = vrot.slane %v1033_v1, 4  ;;  %v1139_v21 = vpop.permute.xlu2 %1138 }
 0x1b1   : > { %2221 = vst.msk [vmem:[%s2998_s22 + $0x5] ss:$8 sm:$0x3] %vm2992_vm11, %v1673_v18  ;;  %v1158_v24 = vadd.f32 %v1157_v14, %v1149_v63  ;;  %v1164_v25 = vadd.f32 %v1163_v16, %v1150_v8  ;;  %v1047_v26 = vrot.slane %v1034_v17, 4  ;;  %v1151_v27 = vmul.f32 %v2950_v13, %v1139_v21 }
 0x1b2   : > { %v1833_v41 = vrot.slane %v1832_v5, 1  ;;  %v1839_v51 = vrot.slane %v1838_v19, 1  ;;  %v1042_v30 = vadd.f32 %v1041_v20, %v1033_v1  ;;  %v1152_v31 = vmul.f32 %v2954_v15, %v1139_v21 }
 0x1b3   : > { %v1159_v33 = vrot.slane %v1158_v24, 2  ;;  %v1165_v34 = vrot.slane %v1164_v25, 2  ;;  %v1048_v35 = vadd.f32 %v1047_v26, %v1034_v17  ;;  %v1169_v36 = vrot.slane %v1151_v27, 4 }
 0x1b4   : > { %v1834_v37 = vadd.f32 %v1833_v41, %v1832_v5  ;;  %v1840_v38 = vadd.f32 %v1839_v51, %v1838_v19  ;;  %v1043_v39 = vrot.slane %v1042_v30, 2  ;;  %v1175_v40 = vrot.slane %v1152_v31, 4 }
 0x1b5   : > { %v1160_v43 = vadd.f32 %v1159_v33, %v1158_v24  ;;  %v1166_v47 = vadd.f32 %v1165_v34, %v1164_v25  ;;  %v1049_v48 = vrot.slane %v1048_v35, 2  ;;  %v1170_v49 = vadd.f32 %v1169_v36, %v1151_v27 }
 0x1b6   : > { %v1877_v50 = vmul.f32 %v2990_v28, %v1834_v37  ;;  %v1878_v52 = vmul.f32 %v2985_v23, %v1840_v38  ;;  %v1044_v53 = vadd.f32 %v1043_v39, %v1042_v30  ;;  %v1176_v54 = vadd.f32 %v1175_v40, %v1152_v31  ;;  %v1359_v55 = vpop.permute.xlu1 %1358  ;;  %v1471_v17 = vpop.permute.xlu0 %1470 }
 0x1b7   : > { %v1161_v56 = vrot.slane %v1160_v43, 1  ;;  %v1167_v29 = vrot.slane %v1166_v47, 1  ;;  %v1050_v58 = vadd.f32 %v1049_v48, %v1048_v35  ;;  %v1171_v60 = vrot.slane %v1170_v49, 2 }
 0x1b8   : > { %v1893_v46 = vrot.slane %v1878_v52, 7  ;;  %v1045_v0 = vrot.slane %v1044_v53, 1  ;;  %v1177_v7 = vrot.slane %v1176_v54, 2  ;;  %v1373_v63 = vmul.f32 %v2936_v62, %v1359_v55 }
 0x1b9   : > { %v1162_v8 = vadd.f32 %v1161_v56, %v1160_v43  ;;  %v1168_v9 = vadd.f32 %v1167_v29, %v1166_v47  ;;  %v1051_v10 = vrot.slane %v1050_v58, 1  ;;  %v1172_v3 = vadd.f32 %v1171_v60, %v1170_v49 }
 0x1ba   : > { %v1897_v6 = vsel %vm1109_vm7, %v1877_v50, %v1893_v46  ;;  %v1046_v1 = vadd.f32 %v1045_v0, %v1044_v53  ;;  %v1178_v14 = vadd.f32 %v1177_v7, %v1176_v54  ;;  %v1374_v16 = vmul.f32 %v2929_v45, %v1359_v55  ;;  %v1363_v36 = vpop.permute.xlu2 %1362 }
 0x1bb   : > { %2229 = vst.msk [vmem:[%s2998_s22 + $0x7] ss:$8 sm:$0x3] %vm2992_vm11, %v1897_v6  ;;  %v1205_v18 = vmul.f32 %v2990_v28, %v1162_v8  ;;  %v1206_v5 = vmul.f32 %v2985_v23, %v1168_v9  ;;  %v1052_v19 = vadd.f32 %v1051_v10, %v1050_v58  ;;  %v1173_v20 = vrot.slane %v1172_v3, 1 }
 0x1bc   : > { %v1089_v21 = vmul.f32 %v2990_v28, %v1046_v1  ;;  %v1179_v24 = vrot.slane %v1178_v14, 1  ;;  %v1381_v25 = vrot.slane %v1373_v63, 4  ;;  %v1387_v26 = vrot.slane %v1374_v16, 4 }
 0x1bd   : > { %v1221_v27 = vrot.slane %v1206_v5, 7  ;;  %v1090_v41 = vmul.f32 %v2985_v23, %v1052_v19  ;;  %v1174_v51 = vadd.f32 %v1173_v20, %v1172_v3  ;;  %v1485_v30 = vmul.f32 %v2936_v62, %v1471_v17 }
 0x1be   : > { %v1180_v31 = vadd.f32 %v1179_v24, %v1178_v14  ;;  %v1382_v33 = vadd.f32 %v1381_v25, %v1373_v63  ;;  %v1388_v34 = vadd.f32 %v1387_v26, %v1374_v16  ;;  %v1486_v35 = vmul.f32 %v2929_v45, %v1471_v17 }
 0x1bf   : > { %v1225_v37 = vsel %vm1109_vm7, %v1205_v18, %v1221_v27  ;;  %v1105_v38 = vrot.slane %v1090_v41, 7  ;;  %v1207_v39 = vmul.f32 %v3005_v57, %v1174_v51  ;;  %v1493_v40 = vrot.slane %v1485_v30, 4  ;;  %v1695_v50 = vpop.permute.xlu1 %1694 }
 0x1c0   : > { %2205 = vst.msk [vmem:[%s2998_s22 + $0x1] ss:$8 sm:$0x3] %vm2992_vm11, %v1225_v37  ;;  %v1208_v43 = vmul.f32 %v3012_v11, %v1180_v31  ;;  %v1383_v47 = vrot.slane %v1382_v33, 2  ;;  %v1389_v48 = vrot.slane %v1388_v34, 2  ;;  %v1499_v49 = vrot.slane %v1486_v35, 4  ;;  %v1587_v25 = vpop.permute.xlu0 %1586 }
 0x1c1   : > { %v1110_v52 = vsel %vm1109_vm7, %v1089_v21, %v1105_v38  ;;  %v1494_v53 = vadd.f32 %v1493_v40, %v1485_v30  ;;  %v1375_v54 = vmul.f32 %v2950_v13, %v1363_v36  ;;  %v1376_v55 = vmul.f32 %v2954_v15, %v1363_v36 }
 0x1c2   : > { %1122 = vst.msk [vmem:[%s2998_s22] ss:$8 sm:$0x3] %vm2992_vm11, %v1110_v52  ;;  %v1222_v56 = vrot.slane %v1208_v43, 7  ;;  %v1384_v29 = vadd.f32 %v1383_v47, %v1382_v33  ;;  %v1390_v58 = vadd.f32 %v1389_v48, %v1388_v34  ;;  %v1500_v60 = vadd.f32 %v1499_v49, %v1486_v35 }
 0x1c3   : > { %v1495_v46 = vrot.slane %v1494_v53, 2  ;;  %v1393_v0 = vrot.slane %v1375_v54, 4  ;;  %v1399_v7 = vrot.slane %v1376_v55, 4  ;;  %v1709_v63 = vmul.f32 %v2936_v62, %v1695_v50  ;;  %v1699_v47 = vpop.permute.xlu2 %1698 }
 0x1c4   : > { %v1226_v8 = vsel %vm1109_vm7, %v1207_v39, %v1222_v56  ;;  %v1385_v9 = vrot.slane %v1384_v29, 1  ;;  %v1391_v10 = vrot.slane %v1390_v58, 1  ;;  %v1501_v3 = vrot.slane %v1500_v60, 2 }
 0x1c5   : > { %2206 = vst.msk [vmem:[%s2998_s22 + $0x11] ss:$8 sm:$0x3] %vm2992_vm11, %v1226_v8  ;;  %v1496_v6 = vadd.f32 %v1495_v46, %v1494_v53  ;;  %v1394_v1 = vadd.f32 %v1393_v0, %v1375_v54  ;;  %v1400_v14 = vadd.f32 %v1399_v7, %v1376_v55  ;;  %v1710_v16 = vmul.f32 %v2929_v45, %v1695_v50 }
 0x1c6   : > { %v1386_v17 = vadd.f32 %v1385_v9, %v1384_v29  ;;  %v1392_v18 = vadd.f32 %v1391_v10, %v1390_v58  ;;  %v1502_v5 = vadd.f32 %v1501_v3, %v1500_v60  ;;  %v1717_v19 = vrot.slane %v1709_v63, 4 }
 0x1c7   : > { %v1497_v20 = vrot.slane %v1496_v6, 1  ;;  %v1395_v21 = vrot.slane %v1394_v1, 2  ;;  %v1401_v62 = vrot.slane %v1400_v14, 2  ;;  %v1723_v24 = vrot.slane %v1710_v16, 4 }
 0x1c8   : > { %v1429_v26 = vmul.f32 %v2990_v28, %v1386_v17  ;;  %v1430_v27 = vmul.f32 %v2985_v23, %v1392_v18  ;;  %v1503_v41 = vrot.slane %v1502_v5, 1  ;;  %v1718_v51 = vadd.f32 %v1717_v19, %v1709_v63 }
 0x1c9   : > { %v1498_v30 = vadd.f32 %v1497_v20, %v1496_v6  ;;  %v1396_v31 = vadd.f32 %v1395_v21, %v1394_v1  ;;  %v1402_v33 = vadd.f32 %v1401_v62, %v1400_v14  ;;  %v1724_v45 = vadd.f32 %v1723_v24, %v1710_v16  ;;  %v1021_v9 = vpop.permute.xlu1 %1020  ;;  %v1143_v62 = vpop.permute.xlu0 %1142 }
 0x1ca   : > { %v1445_v34 = vrot.slane %v1430_v27, 7  ;;  %v1504_v35 = vadd.f32 %v1503_v41, %v1502_v5  ;;  %v1719_v36 = vrot.slane %v1718_v51, 2  ;;  %v1599_v37 = vmul.f32 %v2950_v13, %v1587_v25 }
 0x1cb   : > { %v1541_v38 = vmul.f32 %v2990_v28, %v1498_v30  ;;  %v1397_v39 = vrot.slane %v1396_v31, 1  ;;  %v1403_v40 = vrot.slane %v1402_v33, 1  ;;  %v1725_v43 = vrot.slane %v1724_v45, 2 }
 0x1cc   : > { %v1449_v48 = vsel %vm1109_vm7, %v1429_v26, %v1445_v34  ;;  %v1542_v49 = vmul.f32 %v2985_v23, %v1504_v35  ;;  %v1720_v50 = vadd.f32 %v1719_v36, %v1718_v51  ;;  %v1600_v52 = vmul.f32 %v2954_v15, %v1587_v25 }
 0x1cd   : > { %2213 = vst.msk [vmem:[%s2998_s22 + $0x3] ss:$8 sm:$0x3] %vm2992_vm11, %v1449_v48  ;;  %v1398_v53 = vadd.f32 %v1397_v39, %v1396_v31  ;;  %v1404_v54 = vadd.f32 %v1403_v40, %v1402_v33  ;;  %v1726_v55 = vadd.f32 %v1725_v43, %v1724_v45  ;;  %v1617_v56 = vrot.slane %v1599_v37, 4 }
 0x1ce   : > { %v1557_v29 = vrot.slane %v1542_v49, 7  ;;  %v1721_v58 = vrot.slane %v1720_v50, 1  ;;  %v1623_v60 = vrot.slane %v1600_v52, 4  ;;  %v1711_v46 = vmul.f32 %v2950_v13, %v1699_v47 }
 0x1cf   : > { %v1431_v0 = vmul.f32 %v3005_v57, %v1398_v53  ;;  %v1432_v7 = vmul.f32 %v3012_v11, %v1404_v54  ;;  %v1727_v63 = vrot.slane %v1726_v55, 1  ;;  %v1618_v8 = vadd.f32 %v1617_v56, %v1599_v37 }
 0x1d0   : > { %v1561_v10 = vsel %vm1109_vm7, %v1541_v38, %v1557_v29  ;;  %v1722_v3 = vadd.f32 %v1721_v58, %v1720_v50  ;;  %v1624_v6 = vadd.f32 %v1623_v60, %v1600_v52  ;;  %v1712_v1 = vmul.f32 %v2954_v15, %v1699_v47  ;;  %v1026_v52 = vpop.permute.xlu2 %1025 }
 0x1d1   : > { %2217 = vst.msk [vmem:[%s2998_s22 + $0x4] ss:$8 sm:$0x3] %vm2992_vm11, %v1561_v10  ;;  %v1446_v14 = vrot.slane %v1432_v7, 7  ;;  %v1728_v16 = vadd.f32 %v1727_v63, %v1726_v55  ;;  %v1619_v17 = vrot.slane %v1618_v8, 2  ;;  %v1729_v18 = vrot.slane %v1711_v46, 4 }
 0x1d2   : > { %v1765_v5 = vmul.f32 %v2990_v28, %v1722_v3  ;;  %v1625_v19 = vrot.slane %v1624_v6, 2  ;;  %v1735_v20 = vrot.slane %v1712_v1, 4  ;;  %v1035_v21 = vmul.f32 %v2950_v13, %v1021_v9 }
 0x1d3   : > { %v1450_v24 = vsel %vm1109_vm7, %v1431_v0, %v1446_v14  ;;  %v1766_v25 = vmul.f32 %v2985_v23, %v1728_v16  ;;  %v1620_v26 = vadd.f32 %v1619_v17, %v1618_v8  ;;  %v1730_v27 = vadd.f32 %v1729_v18, %v1711_v46  ;;  %v1251_v18 = vpop.permute.xlu1 %1250 }
 0x1d4   : > { %2214 = vst.msk [vmem:[%s2998_s22 + $0x13] ss:$8 sm:$0x3] %vm2992_vm11, %v1450_v24  ;;  %v1626_v41 = vadd.f32 %v1625_v19, %v1624_v6  ;;  %v1736_v51 = vadd.f32 %v1735_v20, %v1712_v1  ;;  %v1036_v30 = vmul.f32 %v2954_v15, %v1021_v9  ;;  %v1053_v28 = vrot.slane %v1035_v21, 4 }
 0x1d5   : > { %v1781_v31 = vrot.slane %v1766_v25, 7  ;;  %v1621_v33 = vrot.slane %v1620_v26, 1  ;;  %v1731_v45 = vrot.slane %v1730_v27, 2  ;;  %v1153_v34 = vmul.f32 %v2864_v59, %v1143_v62 }
 0x1d6   : > { %v1627_v35 = vrot.slane %v1626_v41, 1  ;;  %v1737_v36 = vrot.slane %v1736_v51, 2  ;;  %v1054_v37 = vadd.f32 %v1053_v28, %v1035_v21  ;;  %v1059_v23 = vrot.slane %v1036_v30, 4 }
 0x1d7   : > { %v1785_v38 = vsel %vm1109_vm7, %v1765_v5, %v1781_v31  ;;  %v1622_v39 = vadd.f32 %v1621_v33, %v1620_v26  ;;  %v1732_v40 = vadd.f32 %v1731_v45, %v1730_v27  ;;  %v1154_v43 = vmul.f32 %v2868_v61, %v1143_v62 }
 0x1d8   : > { %2225 = vst.msk [vmem:[%s2998_s22 + $0x6] ss:$8 sm:$0x3] %vm2992_vm11, %v1785_v38  ;;  %v1628_v47 = vadd.f32 %v1627_v35, %v1626_v41  ;;  %v1738_v48 = vadd.f32 %v1737_v36, %v1736_v51  ;;  %v1055_v49 = vrot.slane %v1054_v37, 2  ;;  %v1060_v50 = vadd.f32 %v1059_v23, %v1036_v30 }
 0x1d9   : > { %v1655_v53 = vmul.f32 %v3005_v57, %v1622_v39  ;;  %v1733_v54 = vrot.slane %v1732_v40, 1  ;;  %v1181_v55 = vrot.slane %v1153_v34, 4  ;;  %v1187_v56 = vrot.slane %v1154_v43, 4 }
 0x1da   : > { %v1656_v29 = vmul.f32 %v3012_v11, %v1628_v47  ;;  %v1739_v58 = vrot.slane %v1738_v48, 1  ;;  %v1056_v60 = vadd.f32 %v1055_v49, %v1054_v37  ;;  %v1061_v46 = vrot.slane %v1060_v50, 2 }
 0x1db   : > { %v1734_v0 = vadd.f32 %v1733_v54, %v1732_v40  ;;  %v1182_v7 = vadd.f32 %v1181_v55, %v1153_v34  ;;  %v1188_v63 = vadd.f32 %v1187_v56, %v1154_v43  ;;  %v1037_v8 = vmul.f32 %v2864_v59, %v1026_v52  ;;  %v1703_v34 = vpop.permute.xlu0 %1702 }
 0x1dc   : > { %v1670_v9 = vrot.slane %v1656_v29, 7  ;;  %v1740_v10 = vadd.f32 %v1739_v58, %v1738_v48  ;;  %v1057_v3 = vrot.slane %v1056_v60, 1  ;;  %v1062_v6 = vadd.f32 %v1061_v46, %v1060_v50 }
 0x1dd   : > { %v1767_v1 = vmul.f32 %v3005_v57, %v1734_v0  ;;  %v1183_v14 = vrot.slane %v1182_v7, 2  ;;  %v1189_v16 = vrot.slane %v1188_v63, 2  ;;  %v1038_v17 = vmul.f32 %v2868_v61, %v1026_v52  ;;  %v1255_v52 = vpop.permute.xlu2 %1254 }
 0x1de   : > { %v1674_v5 = vsel %vm1109_vm7, %v1655_v53, %v1670_v9  ;;  %v1768_v19 = vmul.f32 %v3012_v11, %v1740_v10  ;;  %v1058_v20 = vadd.f32 %v1057_v3, %v1056_v60  ;;  %v1063_v21 = vrot.slane %v1062_v6, 1 }
 0x1df   : > { %2222 = vst.msk [vmem:[%s2998_s22 + $0x15] ss:$8 sm:$0x3] %vm2992_vm11, %v1674_v5  ;;  %v1184_v62 = vadd.f32 %v1183_v14, %v1182_v7  ;;  %v1190_v24 = vadd.f32 %v1189_v16, %v1188_v63  ;;  %v1065_v25 = vrot.slane %v1037_v8, 4  ;;  %v1071_v26 = vrot.slane %v1038_v17, 4 }
 0x1e0   : > { %v1782_v27 = vrot.slane %v1768_v19, 7  ;;  %v1064_v41 = vadd.f32 %v1063_v21, %v1062_v6  ;;  %v1091_v51 = vmul.f32 %v3005_v57, %v1058_v20  ;;  %v1263_v30 = vmul.f32 %v2950_v13, %v1251_v18 }
 0x1e1   : > { %v1185_v28 = vrot.slane %v1184_v62, 1  ;;  %v1191_v31 = vrot.slane %v1190_v24, 1  ;;  %v1066_v33 = vadd.f32 %v1065_v25, %v1037_v8  ;;  %v1072_v45 = vadd.f32 %v1071_v26, %v1038_v17 }
 0x1e2   : > { %v1786_v35 = vsel %vm1109_vm7, %v1767_v1, %v1782_v27  ;;  %v1092_v36 = vmul.f32 %v3012_v11, %v1064_v41  ;;  %v1264_v37 = vmul.f32 %v2954_v15, %v1251_v18  ;;  %v1281_v23 = vrot.slane %v1263_v30, 4  ;;  %v1475_v1 = vpop.permute.xlu1 %1474 }
 0x1e3   : > { %2226 = vst.msk [vmem:[%s2998_s22 + $0x16] ss:$8 sm:$0x3] %vm2992_vm11, %v1786_v35  ;;  %v1186_v38 = vadd.f32 %v1185_v28, %v1184_v62  ;;  %v1192_v39 = vadd.f32 %v1191_v31, %v1190_v24  ;;  %v1067_v40 = vrot.slane %v1066_v33, 2  ;;  %v1073_v43 = vrot.slane %v1072_v45, 2 }
 0x1e4   : > { %v1106_v47 = vrot.slane %v1092_v36, 7  ;;  %v1282_v48 = vadd.f32 %v1281_v23, %v1263_v30  ;;  %v1287_v49 = vrot.slane %v1264_v37, 4  ;;  %v1713_v50 = vmul.f32 %v2864_v59, %v1703_v34  ;;  %v1031_v23 = vpop.permute.xlu0 %1030 }
 0x1e5   : > { %v1209_v53 = vmul.f32 %v3016_v22, %v1186_v38  ;;  %v1210_v54 = vmul.f32 %v3022_v12, %v1192_v39  ;;  %v1068_v55 = vadd.f32 %v1067_v40, %v1066_v33  ;;  %v1074_v56 = vadd.f32 %v1073_v43, %v1072_v45 }
 0x1e6   : > { %v1111_v29 = vsel %vm1109_vm7, %v1091_v51, %v1106_v47  ;;  %v1283_v58 = vrot.slane %v1282_v48, 2  ;;  %v1288_v60 = vadd.f32 %v1287_v49, %v1264_v37  ;;  %v1714_v46 = vmul.f32 %v2868_v61, %v1703_v34 }
 0x1e7   : > { %2202 = vst.msk [vmem:[%s2998_s22 + $0x10] ss:$8 sm:$0x3] %vm2992_vm11, %v1111_v29  ;;  %v1223_v0 = vrot.slane %v1210_v54, 7  ;;  %v1069_v7 = vrot.slane %v1068_v55, 1  ;;  %v1075_v63 = vrot.slane %v1074_v56, 1  ;;  %v1265_v8 = vmul.f32 %v2864_v59, %v1255_v52 }
 0x1e8   : > { %v1284_v9 = vadd.f32 %v1283_v58, %v1282_v48  ;;  %v1289_v10 = vrot.slane %v1288_v60, 2  ;;  %v1741_v3 = vrot.slane %v1713_v50, 4  ;;  %v1747_v6 = vrot.slane %v1714_v46, 4 }
 0x1e9   : > { %v1227_v14 = vsel %vm1109_vm7, %v1209_v53, %v1223_v0  ;;  %v1070_v16 = vadd.f32 %v1069_v7, %v1068_v55  ;;  %v1076_v17 = vadd.f32 %v1075_v63, %v1074_v56  ;;  %v1266_v18 = vmul.f32 %v2868_v61, %v1255_v52 }
 0x1ea   : > { %2207 = vst.msk [vmem:[%s2998_s22 + $0x21] ss:$8 sm:$0x3] %vm2992_vm11, %v1227_v14  ;;  %v1285_v5 = vrot.slane %v1284_v9, 1  ;;  %v1290_v19 = vadd.f32 %v1289_v10, %v1288_v60  ;;  %v1742_v20 = vadd.f32 %v1741_v3, %v1713_v50  ;;  %v1748_v21 = vadd.f32 %v1747_v6, %v1714_v46  ;;  %v1367_v46 = vpop.permute.xlu1 %1366 }
 0x1eb   : > { %v1093_v62 = vmul.f32 %v3016_v22, %v1070_v16  ;;  %v1094_v24 = vmul.f32 %v3022_v12, %v1076_v17  ;;  %v1293_v25 = vrot.slane %v1265_v8, 4  ;;  %v1299_v26 = vrot.slane %v1266_v18, 4 }
 0x1ec   : > { %v1286_v27 = vadd.f32 %v1285_v5, %v1284_v9  ;;  %v1291_v41 = vrot.slane %v1290_v19, 1  ;;  %v1743_v51 = vrot.slane %v1742_v20, 2  ;;  %v1749_v30 = vrot.slane %v1748_v21, 2  ;;  %v1479_v9 = vpop.permute.xlu2 %1478 }
 0x1ed   : > { %v1107_v28 = vrot.slane %v1094_v24, 7  ;;  %v1294_v31 = vadd.f32 %v1293_v25, %v1265_v8  ;;  %v1300_v33 = vadd.f32 %v1299_v26, %v1266_v18  ;;  %v1487_v45 = vmul.f32 %v2950_v13, %v1475_v1 }
 0x1ee   : > { %v1292_v34 = vadd.f32 %v1291_v41, %v1290_v19  ;;  %v1319_v35 = vmul.f32 %v3005_v57, %v1286_v27  ;;  %v1744_v36 = vadd.f32 %v1743_v51, %v1742_v20  ;;  %v1750_v37 = vadd.f32 %v1749_v30, %v1748_v21 }
 0x1ef   : > { %v1112_v38 = vsel %vm1109_vm7, %v1093_v62, %v1107_v28  ;;  %v1295_v39 = vrot.slane %v1294_v31, 2  ;;  %v1301_v40 = vrot.slane %v1300_v33, 2  ;;  %v1488_v43 = vmul.f32 %v2954_v15, %v1475_v1 }
 0x1f0   : > { %2203 = vst.msk [vmem:[%s2998_s22 + $0x20] ss:$8 sm:$0x3] %vm2992_vm11, %v1112_v38  ;;  %v1320_v47 = vmul.f32 %v3012_v11, %v1292_v34  ;;  %v1745_v48 = vrot.slane %v1744_v36, 1  ;;  %v1751_v49 = vrot.slane %v1750_v37, 1  ;;  %v1505_v50 = vrot.slane %v1487_v45, 4 }
 0x1f1   : > { %v1296_v52 = vadd.f32 %v1295_v39, %v1294_v31  ;;  %v1302_v53 = vadd.f32 %v1301_v40, %v1300_v33  ;;  %v1511_v54 = vrot.slane %v1488_v43, 4  ;;  %v1039_v55 = vmul.f32 %v2873_v2, %v1031_v23 }
 0x1f2   : > { %v1334_v56 = vrot.slane %v1320_v47, 7  ;;  %v1746_v29 = vadd.f32 %v1745_v48, %v1744_v36  ;;  %v1752_v58 = vadd.f32 %v1751_v49, %v1750_v37  ;;  %v1506_v60 = vadd.f32 %v1505_v50, %v1487_v45 }
 0x1f3   : > { %v1297_v0 = vrot.slane %v1296_v52, 1  ;;  %v1303_v7 = vrot.slane %v1302_v53, 1  ;;  %v1512_v63 = vadd.f32 %v1511_v54, %v1488_v43  ;;  %v1040_v8 = vmul.f32 %v2876_v4, %v1031_v23  ;;  %v1259_v43 = vpop.permute.xlu0 %1258 }
 0x1f4   : > { %v1338_v10 = vsel %vm1109_vm7, %v1319_v35, %v1334_v56  ;;  %v1769_v3 = vmul.f32 %v3016_v22, %v1746_v29  ;;  %v1770_v6 = vmul.f32 %v3022_v12, %v1752_v58  ;;  %v1507_v1 = vrot.slane %v1506_v60, 2 }
 0x1f5   : > { %2210 = vst.msk [vmem:[%s2998_s22 + $0x12] ss:$8 sm:$0x3] %vm2992_vm11, %v1338_v10  ;;  %v1298_v14 = vadd.f32 %v1297_v0, %v1296_v52  ;;  %v1304_v16 = vadd.f32 %v1303_v7, %v1302_v53  ;;  %v1513_v17 = vrot.slane %v1512_v63, 2  ;;  %v1077_v18 = vrot.slane %v1039_v55, 4  ;;  %v1591_v52 = vpop.permute.xlu1 %1590 }
 0x1f6   : > { %v1783_v5 = vrot.slane %v1770_v6, 7  ;;  %v1508_v19 = vadd.f32 %v1507_v1, %v1506_v60  ;;  %v1083_v20 = vrot.slane %v1040_v8, 4  ;;  %v1489_v21 = vmul.f32 %v2864_v59, %v1479_v9  ;;  %v1371_v1 = vpop.permute.xlu2 %1370 }
 0x1f7   : > { %v1321_v62 = vmul.f32 %v3016_v22, %v1298_v14  ;;  %v1322_v24 = vmul.f32 %v3022_v12, %v1304_v16  ;;  %v1514_v25 = vadd.f32 %v1513_v17, %v1512_v63  ;;  %v1078_v26 = vadd.f32 %v1077_v18, %v1039_v55 }
 0x1f8   : > { %v1787_v27 = vsel %vm1109_vm7, %v1769_v3, %v1783_v5  ;;  %v1509_v41 = vrot.slane %v1508_v19, 1  ;;  %v1084_v51 = vadd.f32 %v1083_v20, %v1040_v8  ;;  %v1490_v30 = vmul.f32 %v2868_v61, %v1479_v9 }
 0x1f9   : > { %2227 = vst.msk [vmem:[%s2998_s22 + $0x26] ss:$8 sm:$0x3] %vm2992_vm11, %v1787_v27  ;;  %v1335_v28 = vrot.slane %v1322_v24, 7  ;;  %v1515_v31 = vrot.slane %v1514_v25, 1  ;;  %v1079_v33 = vrot.slane %v1078_v26, 2  ;;  %v1377_v45 = vmul.f32 %v2864_v59, %v1367_v46 }
 0x1fa   : > { %v1510_v34 = vadd.f32 %v1509_v41, %v1508_v19  ;;  %v1085_v35 = vrot.slane %v1084_v51, 2  ;;  %v1517_v36 = vrot.slane %v1489_v21, 4  ;;  %v1523_v37 = vrot.slane %v1490_v30, 4 }
 0x1fb   : > { %v1339_v23 = vsel %vm1109_vm7, %v1321_v62, %v1335_v28  ;;  %v1516_v38 = vadd.f32 %v1515_v31, %v1514_v25  ;;  %v1080_v39 = vadd.f32 %v1079_v33, %v1078_v26  ;;  %v1378_v40 = vmul.f32 %v2868_v61, %v1367_v46 }
 0x1fc   : > { %2211 = vst.msk [vmem:[%s2998_s22 + $0x22] ss:$8 sm:$0x3] %vm2992_vm11, %v1339_v23  ;;  %v1543_v47 = vmul.f32 %v3005_v57, %v1510_v34  ;;  %v1086_v48 = vadd.f32 %v1085_v35, %v1084_v51  ;;  %v1518_v49 = vadd.f32 %v1517_v36, %v1489_v21  ;;  %v1524_v50 = vadd.f32 %v1523_v37, %v1490_v30 }
 0x1fd   : > { %v1544_v53 = vmul.f32 %v3012_v11, %v1516_v38  ;;  %v1081_v54 = vrot.slane %v1080_v39, 1  ;;  %v1405_v55 = vrot.slane %v1377_v45, 4  ;;  %v1411_v56 = vrot.slane %v1378_v40, 4  ;;  %v3172_v23 = vpop.permute.xlu1 %1146 }
 0x1fe   : > { %v1087_v29 = vrot.slane %v1086_v48, 1  ;;  %v1519_v58 = vrot.slane %v1518_v49, 2  ;;  %v1525_v60 = vrot.slane %v1524_v50, 2  ;;  %v1267_v46 = vmul.f32 %v2873_v2, %v1259_v43 }
 0x1ff   : > { %v1558_v0 = vrot.slane %v1544_v53, 7  ;;  %v1082_v7 = vadd.f32 %v1081_v54, %v1080_v39  ;;  %v1406_v63 = vadd.f32 %v1405_v55, %v1377_v45  ;;  %v1412_v8 = vadd.f32 %v1411_v56, %v1378_v40  ;;  %v1819_v53 = vpop.permute.xlu0 %1818 }
 0x200   : > { %v1088_v9 = vadd.f32 %v1087_v29, %v1086_v48  ;;  %v1520_v10 = vadd.f32 %v1519_v58, %v1518_v49  ;;  %v1526_v3 = vadd.f32 %v1525_v60, %v1524_v50  ;;  %v1268_v6 = vmul.f32 %v2876_v4, %v1259_v43 }
 0x201   : > { %v1562_v14 = vsel %vm1109_vm7, %v1543_v47, %v1558_v0  ;;  %v1095_v16 = vmul.f32 %v3025_v32, %v1082_v7  ;;  %v1407_v17 = vrot.slane %v1406_v63, 2  ;;  %v1413_v18 = vrot.slane %v1412_v8, 2 }
 0x202   : > { %2218 = vst.msk [vmem:[%s2998_s22 + $0x14] ss:$8 sm:$0x3] %vm2992_vm11, %v1562_v14  ;;  %v1096_v5 = vmul.f32 %v3027_v42, %v1088_v9  ;;  %v1521_v19 = vrot.slane %v1520_v10, 1  ;;  %v1527_v20 = vrot.slane %v1526_v3, 1  ;;  %v1305_v21 = vrot.slane %v1267_v46, 4 }
 0x203   : > { %v1408_v62 = vadd.f32 %v1407_v17, %v1406_v63  ;;  %v1414_v24 = vadd.f32 %v1413_v18, %v1412_v8  ;;  %v1311_v25 = vrot.slane %v1268_v6, 4  ;;  %v1379_v26 = vmul.f32 %v2873_v2, %v1371_v1 }
 0x204   : > { %v1108_v27 = vrot.slane %v1096_v5, 7  ;;  %v1522_v41 = vadd.f32 %v1521_v19, %v1520_v10  ;;  %v1528_v51 = vadd.f32 %v1527_v20, %v1526_v3  ;;  %v1306_v30 = vadd.f32 %v1305_v21, %v1267_v46  ;;  %v1595_v5 = vpop.permute.xlu2 %1594 }
 0x205   : > { %v1409_v28 = vrot.slane %v1408_v62, 1  ;;  %v1415_v31 = vrot.slane %v1414_v24, 1  ;;  %v1312_v33 = vadd.f32 %v1311_v25, %v1268_v6  ;;  %v1380_v45 = vmul.f32 %v2876_v4, %v1371_v1 }
 0x206   : > { %v1113_v34 = vsel %vm1109_vm7, %v1095_v16, %v1108_v27  ;;  %v1545_v35 = vmul.f32 %v3016_v22, %v1522_v41  ;;  %v1546_v36 = vmul.f32 %v3022_v12, %v1528_v51  ;;  %v1307_v37 = vrot.slane %v1306_v30, 2 }
 0x207   : > { %2204 = vst.msk [vmem:[%s2998_s22 + $0x30] ss:$8 sm:$0x3] %vm2992_vm11, %v1113_v34  ;;  %v1410_v38 = vadd.f32 %v1409_v28, %v1408_v62  ;;  %v1416_v39 = vadd.f32 %v1415_v31, %v1414_v24  ;;  %v1313_v40 = vrot.slane %v1312_v33, 2  ;;  %v1417_v43 = vrot.slane %v1379_v26, 4  ;;  %v3194_v28 = vpop.permute.xlu1 %1482 }
 0x208   : > { %v1559_v47 = vrot.slane %v1546_v36, 7  ;;  %v1308_v48 = vadd.f32 %v1307_v37, %v1306_v30  ;;  %v1423_v49 = vrot.slane %v1380_v45, 4  ;;  %v1601_v50 = vmul.f32 %v2864_v59, %v1591_v52 }
 0x209   : > { %v1433_v54 = vmul.f32 %v3016_v22, %v1410_v38  ;;  %v1434_v55 = vmul.f32 %v3022_v12, %v1416_v39  ;;  %v1314_v56 = vadd.f32 %v1313_v40, %v1312_v33  ;;  %v1418_v29 = vadd.f32 %v1417_v43, %v1379_v26 }
 0x20a   : > { %v1563_v58 = vsel %vm1109_vm7, %v1545_v35, %v1559_v47  ;;  %v1309_v60 = vrot.slane %v1308_v48, 1  ;;  %v1424_v46 = vadd.f32 %v1423_v49, %v1380_v45  ;;  %v1602_v0 = vmul.f32 %v2868_v61, %v1591_v52 }
 0x20b   : > { %2219 = vst.msk [vmem:[%s2998_s22 + $0x24] ss:$8 sm:$0x3] %vm2992_vm11, %v1563_v58  ;;  %v1447_v7 = vrot.slane %v1434_v55, 7  ;;  %v1315_v63 = vrot.slane %v1314_v56, 1  ;;  %v1419_v8 = vrot.slane %v1418_v29, 2  ;;  %v1827_v9 = vmul.f32 %v2873_v2, %v1819_v53 }
 0x20c   : > { %v1310_v10 = vadd.f32 %v1309_v60, %v1308_v48  ;;  %v1425_v3 = vrot.slane %v1424_v46, 2  ;;  %v1629_v6 = vrot.slane %v1601_v50, 4  ;;  %v1635_v1 = vrot.slane %v1602_v0, 4 }
 0x20d   : > { %v1451_v14 = vsel %vm1109_vm7, %v1433_v54, %v1447_v7  ;;  %v1316_v16 = vadd.f32 %v1315_v63, %v1314_v56  ;;  %v1420_v17 = vadd.f32 %v1419_v8, %v1418_v29  ;;  %v1828_v18 = vmul.f32 %v2876_v4, %v1819_v53 }
 0x20e   : > { %2215 = vst.msk [vmem:[%s2998_s22 + $0x23] ss:$8 sm:$0x3] %vm2992_vm11, %v1451_v14  ;;  %v1323_v52 = vmul.f32 %v3025_v32, %v1310_v10  ;;  %v1426_v19 = vadd.f32 %v1425_v3, %v1424_v46  ;;  %v1630_v20 = vadd.f32 %v1629_v6, %v1601_v50  ;;  %v1636_v21 = vadd.f32 %v1635_v1, %v1602_v0  ;;  %v1815_v10 = vpop.permute.xlu2 %1814 }
 0x20f   : > { %v1324_v62 = vmul.f32 %v3027_v42, %v1316_v16  ;;  %v1421_v24 = vrot.slane %v1420_v17, 1  ;;  %v1865_v25 = vrot.slane %v1827_v9, 4  ;;  %v1871_v26 = vrot.slane %v1828_v18, 4 }
 0x210   : > { %v1427_v27 = vrot.slane %v1426_v19, 1  ;;  %v1631_v41 = vrot.slane %v1630_v20, 2  ;;  %v1637_v51 = vrot.slane %v1636_v21, 2  ;;  %v1603_v30 = vmul.f32 %v2873_v2, %v1595_v5 }
 0x211   : > { %v1336_v31 = vrot.slane %v1324_v62, 7  ;;  %v1422_v33 = vadd.f32 %v1421_v24, %v1420_v17  ;;  %v1866_v45 = vadd.f32 %v1865_v25, %v1827_v9  ;;  %v1872_v34 = vadd.f32 %v1871_v26, %v1828_v18 }
 0x212   : > { %v1428_v35 = vadd.f32 %v1427_v27, %v1426_v19  ;;  %v1632_v36 = vadd.f32 %v1631_v41, %v1630_v20  ;;  %v1638_v37 = vadd.f32 %v1637_v51, %v1636_v21  ;;  %v1604_v38 = vmul.f32 %v2876_v4, %v1595_v5  ;;  %v1707_v21 = vpop.permute.xlu1 %1706 }
 0x213   : > { %v1340_v39 = vsel %vm1109_vm7, %v1323_v52, %v1336_v31  ;;  %v1435_v40 = vmul.f32 %v3025_v32, %v1422_v33  ;;  %v1867_v43 = vrot.slane %v1866_v45, 2  ;;  %v1873_v47 = vrot.slane %v1872_v34, 2 }
 0x214   : > { %2212 = vst.msk [vmem:[%s2998_s22 + $0x32] ss:$8 sm:$0x3] %vm2992_vm11, %v1340_v39  ;;  %v1436_v48 = vmul.f32 %v3027_v42, %v1428_v35  ;;  %v1633_v49 = vrot.slane %v1632_v36, 1  ;;  %v1639_v50 = vrot.slane %v1638_v37, 1  ;;  %v1641_v53 = vrot.slane %v1603_v30, 4 }
 0x215   : > { %v1868_v54 = vadd.f32 %v1867_v43, %v1866_v45  ;;  %v1874_v55 = vadd.f32 %v1873_v47, %v1872_v34  ;;  %v1647_v56 = vrot.slane %v1604_v38, 4  ;;  %v1155_v29 = vmul.f32 %v2873_v2, %v3172_v23 }
 0x216   : > { %v1448_v58 = vrot.slane %v1436_v48, 7  ;;  %v1634_v60 = vadd.f32 %v1633_v49, %v1632_v36  ;;  %v1640_v46 = vadd.f32 %v1639_v50, %v1638_v37  ;;  %v1642_v0 = vadd.f32 %v1641_v53, %v1603_v30 }
 0x217   : > { %v1869_v7 = vrot.slane %v1868_v54, 1  ;;  %v1875_v63 = vrot.slane %v1874_v55, 1  ;;  %v1648_v8 = vadd.f32 %v1647_v56, %v1604_v38  ;;  %v1156_v9 = vmul.f32 %v2876_v4, %v3172_v23 }
 0x218   : > { %v1452_v3 = vsel %vm1109_vm7, %v1435_v40, %v1448_v58  ;;  %v1657_v6 = vmul.f32 %v3016_v22, %v1634_v60  ;;  %v1658_v1 = vmul.f32 %v3022_v12, %v1640_v46  ;;  %v1643_v14 = vrot.slane %v1642_v0, 2 }
 0x219   : > { %2216 = vst.msk [vmem:[%s2998_s22 + $0x33] ss:$8 sm:$0x3] %vm2992_vm11, %v1452_v3  ;;  %v1870_v16 = vadd.f32 %v1869_v7, %v1868_v54  ;;  %v1876_v17 = vadd.f32 %v1875_v63, %v1874_v55  ;;  %v1649_v18 = vrot.slane %v1648_v8, 2  ;;  %v1193_v5 = vrot.slane %v1155_v29, 4 }
 0x21a   : > { %v1671_v52 = vrot.slane %v1658_v1, 7  ;;  %v1644_v19 = vadd.f32 %v1643_v14, %v1642_v0  ;;  %v1199_v20 = vrot.slane %v1156_v9, 4  ;;  %v1825_v23 = vmul.f32 %v2864_v59, %v1815_v10  ;;  %v1811_v3 = vpop.permute.xlu1 %1810 }
 0x21b   : > { %v1883_v62 = vmul.f32 %v3025_v32, %v1870_v16  ;;  %v1884_v24 = vmul.f32 %v3027_v42, %v1876_v17  ;;  %v1650_v25 = vadd.f32 %v1649_v18, %v1648_v8  ;;  %v1194_v26 = vadd.f32 %v1193_v5, %v1155_v29 }
 0x21c   : > { %v1675_v27 = vsel %vm1109_vm7, %v1657_v6, %v1671_v52  ;;  %v1645_v41 = vrot.slane %v1644_v19, 1  ;;  %v1200_v51 = vadd.f32 %v1199_v20, %v1156_v9  ;;  %v1826_v30 = vmul.f32 %v2868_v61, %v1815_v10 }
 0x21d   : > { %2223 = vst.msk [vmem:[%s2998_s22 + $0x25] ss:$8 sm:$0x3] %vm2992_vm11, %v1675_v27  ;;  %v1896_v31 = vrot.slane %v1884_v24, 7  ;;  %v1651_v33 = vrot.slane %v1650_v25, 1  ;;  %v1195_v59 = vrot.slane %v1194_v26, 2  ;;  %v1491_v45 = vmul.f32 %v2873_v2, %v3194_v28 }
 0x21e   : > { %v1646_v34 = vadd.f32 %v1645_v41, %v1644_v19  ;;  %v1201_v35 = vrot.slane %v1200_v51, 2  ;;  %v1853_v36 = vrot.slane %v1825_v23, 4  ;;  %v1859_v37 = vrot.slane %v1826_v30, 4 }
 0x21f   : > { %v1900_v38 = vsel %vm1109_vm7, %v1883_v62, %v1896_v31  ;;  %v1652_v39 = vadd.f32 %v1651_v33, %v1650_v25  ;;  %v1196_v40 = vadd.f32 %v1195_v59, %v1194_v26  ;;  %v1492_v61 = vmul.f32 %v2876_v4, %v3194_v28 }
 0x220   : > { %2232 = vst.msk [vmem:[%s2998_s22 + $0x37] ss:$8 sm:$0x3] %vm2992_vm11, %v1900_v38  ;;  %v1659_v43 = vmul.f32 %v3025_v32, %v1646_v34  ;;  %v1202_v47 = vadd.f32 %v1201_v35, %v1200_v51  ;;  %v1854_v48 = vadd.f32 %v1853_v36, %v1825_v23  ;;  %v1860_v49 = vadd.f32 %v1859_v37, %v1826_v30 }
 0x221   : > { %v1660_v50 = vmul.f32 %v3027_v42, %v1652_v39  ;;  %v1197_v53 = vrot.slane %v1196_v40, 1  ;;  %v1529_v54 = vrot.slane %v1491_v45, 4  ;;  %v1535_v55 = vrot.slane %v1492_v61, 4 }
 0x222   : > { %v1203_v56 = vrot.slane %v1202_v47, 1  ;;  %v1855_v29 = vrot.slane %v1854_v48, 2  ;;  %v1861_v58 = vrot.slane %v1860_v49, 2  ;;  %v1715_v60 = vmul.f32 %v2873_v2, %v1707_v21 }
 0x223   : > { %v1672_v28 = vrot.slane %v1660_v50, 7  ;;  %v1198_v46 = vadd.f32 %v1197_v53, %v1196_v40  ;;  %v1530_v0 = vadd.f32 %v1529_v54, %v1491_v45  ;;  %v1536_v7 = vadd.f32 %v1535_v55, %v1492_v61 }
 0x224   : > { %v1204_v63 = vadd.f32 %v1203_v56, %v1202_v47  ;;  %v1856_v8 = vadd.f32 %v1855_v29, %v1854_v48  ;;  %v1862_v9 = vadd.f32 %v1861_v58, %v1860_v49  ;;  %v1716_v10 = vmul.f32 %v2876_v4, %v1707_v21 }
 0x225   : > { %v1676_v6 = vsel %vm1109_vm7, %v1659_v43, %v1672_v28  ;;  %v1211_v1 = vmul.f32 %v3025_v32, %v1198_v46  ;;  %v1531_v14 = vrot.slane %v1530_v0, 2  ;;  %v1537_v16 = vrot.slane %v1536_v7, 2 }
 0x226   : > { %2224 = vst.msk [vmem:[%s2998_s22 + $0x35] ss:$8 sm:$0x3] %vm2992_vm11, %v1676_v6  ;;  %v1212_v2 = vmul.f32 %v3027_v42, %v1204_v63  ;;  %v1857_v17 = vrot.slane %v1856_v8, 1  ;;  %v1863_v18 = vrot.slane %v1862_v9, 1  ;;  %v1753_v5 = vrot.slane %v1715_v60, 4 }
 0x227   : > { %v1532_v52 = vadd.f32 %v1531_v14, %v1530_v0  ;;  %v1538_v19 = vadd.f32 %v1537_v16, %v1536_v7  ;;  %v1759_v20 = vrot.slane %v1716_v10, 4  ;;  %v1823_v4 = vmul.f32 %v2950_v13, %v1811_v3 }
 0x228   : > { %v1224_v23 = vrot.slane %v1212_v2, 7  ;;  %v1858_v21 = vadd.f32 %v1857_v17, %v1856_v8  ;;  %v1864_v62 = vadd.f32 %v1863_v18, %v1862_v9  ;;  %v1754_v24 = vadd.f32 %v1753_v5, %v1715_v60 }
 0x229   : > { %v1533_v25 = vrot.slane %v1532_v52, 1  ;;  %v1539_v26 = vrot.slane %v1538_v19, 1  ;;  %v1760_v27 = vadd.f32 %v1759_v20, %v1716_v10  ;;  %v1824_v41 = vmul.f32 %v2954_v15, %v1811_v3 }
 0x22a   : > { %v1228_v51 = vsel %vm1109_vm7, %v1211_v1, %v1224_v23  ;;  %v1882_v30 = vmul.f32 %v3022_v12, %v1864_v62  ;;  %v1755_v31 = vrot.slane %v1754_v24, 2  ;;  %v1841_v45 = vrot.slane %v1823_v4, 4 }
 0x22b   : > { %2208 = vst.msk [vmem:[%s2998_s22 + $0x31] ss:$8 sm:$0x3] %vm2992_vm11, %v1228_v51  ;;  %v1534_v33 = vadd.f32 %v1533_v25, %v1532_v52  ;;  %v1540_v13 = vadd.f32 %v1539_v26, %v1538_v19  ;;  %v1761_v59 = vrot.slane %v1760_v27, 2  ;;  %v1881_v34 = vmul.f32 %v3016_v22, %v1858_v21 }
 0x22c   : > { %v1895_v35 = vrot.slane %v1882_v30, 7  ;;  %v1756_v36 = vadd.f32 %v1755_v31, %v1754_v24  ;;  %v1847_v37 = vrot.slane %v1824_v41, 4  ;;  %v1842_v12 = vadd.f32 %v1841_v45, %v1823_v4 }
 0x22d   : > { %v1548_v15 = vmul.f32 %v3027_v42, %v1540_v13  ;;  %v1762_v38 = vadd.f32 %v1761_v59, %v1760_v27  ;;  %v1547_v43 = vmul.f32 %v3025_v32, %v1534_v33 }
 0x22e   : > { %v1899_v39 = vsel %vm1109_vm7, %v1881_v34, %v1895_v35  ;;  %v1757_v40 = vrot.slane %v1756_v36, 1  ;;  %v1848_v61 = vadd.f32 %v1847_v37, %v1824_v41  ;;  %v1843_v48 = vrot.slane %v1842_v12, 2 }
 0x22f   : > { %2231 = vst.msk [vmem:[%s2998_s22 + $0x27] ss:$8 sm:$0x3] %vm2992_vm11, %v1899_v39  ;;  %v1560_v47 = vrot.slane %v1548_v15, 7  ;;  %v1763_v22 = vrot.slane %v1762_v38, 1 }
 0x230   : > { %v1849_v49 = vrot.slane %v1848_v61, 2  ;;  %v1758_v53 = vadd.f32 %v1757_v40, %v1756_v36  ;;  %v1844_v55 = vadd.f32 %v1843_v48, %v1842_v12 }
 0x231   : > { %v1564_v50 = vsel %vm1109_vm7, %v1547_v43, %v1560_v47  ;;  %v1764_v54 = vadd.f32 %v1763_v22, %v1762_v38 }
 0x232   : > { %2220 = vst.msk [vmem:[%s2998_s22 + $0x34] ss:$8 sm:$0x3] %vm2992_vm11, %v1564_v50  ;;  %v1850_v56 = vadd.f32 %v1849_v49, %v1848_v61  ;;  %v1845_v58 = vrot.slane %v1844_v55, 1  ;;  %v1771_v28 = vmul.f32 %v3025_v32, %v1758_v53 }
 0x233   : > { %v1772_v29 = vmul.f32 %v3027_v42, %v1764_v54 }
 0x234   : > { %v1851_v60 = vrot.slane %v1850_v56, 1  ;;  %v1846_v0 = vadd.f32 %v1845_v58, %v1844_v55 }
 0x235   : > { %v1784_v46 = vrot.slane %v1772_v29, 7 }
 0x236   : > { %v1852_v7 = vadd.f32 %v1851_v60, %v1850_v56  ;;  %v1879_v8 = vmul.f32 %v3005_v57, %v1846_v0 }
 0x237   : > { %v1788_v63 = vsel %vm1109_vm7, %v1771_v28, %v1784_v46 }
 0x238   : > { %2228 = vst.msk [vmem:[%s2998_s22 + $0x36] ss:$8 sm:$0x3] %vm2992_vm11, %v1788_v63  ;;  %v1880_v42 = vmul.f32 %v3012_v11, %v1852_v7 }
 0x23a   : > { %v1894_v9 = vrot.slane %v1880_v42, 7 }
 0x23c   : > { %v1898_v32 = vsel %vm1109_vm7, %v1879_v8, %v1894_v9 }
 0x23d   : > { %2230 = vst.msk [vmem:[%s2998_s22 + $0x17] ss:$8 sm:$0x3] %vm2992_vm11, %v1898_v32 }
 0x23e   : > { %2417 = shalt.err (!%p2414_p3)
}
 0x23f   : > { %s2463_s20 = smov 256   ;;  %s2464_s22 = smov 16  }
 0x240   : > { %2283 = dma.vmem_to_hbm [thread:$0]  (%p2543_p5), %s1932_s28, 1024, %s1934_s13, %s1918_s17, %s2463_s20, %s2463_s20, %s2464_s22  }
 0x241 PF: > { %p2289_p4 = scmp.ge.s32.totalorder %s2452_s27, 2  ;;  %s1948_s29 = sand.u32 1, %s2440_s24  }
 0x242   : > { %s1949_s8 = scalar_lea.sflag [#allocation3], %s1948_s29 }
 0x243   : > { %p2286_p7 = pnand %p2289_p4, %p2547_p6 }
 0x245   : > { %p2287_p8 = pneg %p2286_p7 }
 0x247   : > { %2435 = dma.done.wait (%p2287_p8), %s1949_s8, 1024  }
 0x248   : > { %2437 = vsyncadd (%p2287_p8), %s1949_s8, 4294966272  ;;  %p17_p9 = scmp.ge.s32.totalorder %s2530_s30, 4   ;;  %s3323_s24 = smov %s2444_s25 }
 0x249   : > { %s3324_s25 = smov %s2448_s26  ;;  %s3325_s26 = smov %s2541_s10 }
 0x24a   : > { %s3326_s27 = smov %s2530_s30  ;;  %19 = sbr.rel (!%p17_p9) target bundleno = 3 (0x3), region = 118 }
 0x24f   :  { %1955 = vsyncpa [#allocation3], 1 }
 0x250   :  { %1957 = vsyncpa [#allocation3 + $0x1], 1 }

</bundles_post_ra>
